<compile_context>
chip_gen: v5e
topology: v5e:2x2
jax: 0.10.0
libtpu: 0.0.40
codegen_flags: <defaults>
</compile_context>

<pallas_src>
import math
from functools import partial

import jax
import jax.numpy as jnp
from jax import lax
from jax.experimental import pallas as pl
from jax.experimental.pallas import tpu as pltpu

NEG_SLOPE = 0.01
LANE = 128           # every feature axis is padded to one full vreg lane width
HALF = LANE // 2     # log_var / eps lanes live at [HALF, HALF+n_latent)
N_WSLOTS = 6         # enc0, enc1, fused heads, dec0, dec1, dec2


def _round_up(x, m):
    return ((x + m - 1) // m) * m


def _leaky_relu(v):
    return jnp.where(v >= 0, v, NEG_SLOPE * v)


# --------------------------------------------------------------------------- kernel
def _mdvae_kernel(xin_ref, w_ref, b_ref, out_ref, *, n_latent):
    tb, lanes = xin_ref.shape
    mm = w_ref.dtype            # matmul operand dtype (bf16; f32 accumulate below)

    xin = xin_ref[...]                                   # x @ [0,nd), eps @ [64,64+L)
    eps_aligned = pltpu.roll(xin, lanes // 2, axis=1)    # eps @ [0,L); 64-lane roll is
                                                         # direction-agnostic on 128 lanes

    # ----- encoder: zero-padded weight rows/cols keep every pad lane exactly 0;
    #       the eps lanes of the packed input meet zero rows of w[0] -> invisible. -----
    h = jnp.dot(xin.astype(mm), w_ref[0], preferred_element_type=jnp.float32) + b_ref[0]
    h = _leaky_relu(h)
    h = jnp.dot(h.astype(mm), w_ref[1], preferred_element_type=jnp.float32) + b_ref[1]
    h = _leaky_relu(h)

    # ----- fused mean / log_var heads: ONE matmul.  mean @ [0,L), log_var @ [64,64+L). -----
    head = jnp.dot(h.astype(mm), w_ref[2], preferred_element_type=jnp.float32) + b_ref[2]

    # ----- reparameterization, fully lane-parallel.
    # Only the exp/std path is masked (prevents exp(rolled garbage) overflow); any
    # finite garbage left in z's pad lanes is annihilated by the zero rows (>= L)
    # of the first decoder weight, so no mean-side mask is needed. -----
    lv_aligned = pltpu.roll(head, lanes // 2, axis=1)    # log_var @ [0,L)
    lane_id = lax.broadcasted_iota(jnp.int32, (tb, lanes), 1)
    std = jnp.exp(0.5 * jnp.where(lane_id < n_latent, lv_aligned, 0.0))
    z = head + std * eps_aligned                         # lanes [0,L) hold the true z

    # ----- decoder -----
    d = jnp.dot(z.astype(mm), w_ref[3], preferred_element_type=jnp.float32) + b_ref[3]
    d = _leaky_relu(d)
    d = jnp.dot(d.astype(mm), w_ref[4], preferred_element_type=jnp.float32) + b_ref[4]
    d = _leaky_relu(d)
    recon = jnp.dot(d.astype(mm), w_ref[5], preferred_element_type=jnp.float32) + b_ref[5]

    # ----- ONE unmasked 128-lane store: mean @ [0,L), log_var @ [64,64+L),
    #       recon @ [64+L, 64+L+n_data); head and recon lanes are disjoint. -----
    out_ref[...] = head + recon


# ------------------------------------------------------------------- host packing
def pack_params(p, n_data, n_latent, n_hidden, matmul_dtype=jnp.bfloat16):
    """Pack the 7 Linear layers into one (6,128,128) weight slab (fused mean/log_var
    head, lane-offset final decoder) and one (6,1,128) f32 bias slab."""
    L = n_latent
    assert n_hidden <= LANE and L <= n_data and n_data + L <= HALF
    r_off = HALF + L                                     # recon lane offset

    w = jnp.zeros((N_WSLOTS, LANE, LANE), jnp.float32)
    b = jnp.zeros((N_WSLOTS, 1, LANE), jnp.float32)

    w = w.at[0, :n_data, :n_hidden].set(p["w1"])          # encoder L0
    b = b.at[0, 0, :n_hidden].set(p["b1"])
    w = w.at[1, :n_hidden, :n_hidden].set(p["w2"])        # encoder L1
    b = b.at[1, 0, :n_hidden].set(p["b2"])
    # fused mean / log_var heads -> single matmul; log_var offset by HALF lanes
    w = w.at[2, :n_hidden, :L].set(p["wm"])
    w = w.at[2, :n_hidden, HALF:HALF + L].set(p["wv"])
    b = b.at[2, 0, :L].set(p["bm"])
    b = b.at[2, 0, HALF:HALF + L].set(p["bv"])
    w = w.at[3, :L, :n_hidden].set(p["wd1"])              # decoder L0
    b = b.at[3, 0, :n_hidden].set(p["bd1"])
    w = w.at[4, :n_hidden, :n_hidden].set(p["wd2"])       # decoder L1
    b = b.at[4, 0, :n_hidden].set(p["bd2"])
    w = w.at[5, :n_hidden, r_off:r_off + n_data].set(p["wd3"])   # decoder L2 (lane-offset)
    b = b.at[5, 0, r_off:r_off + n_data].set(p["bd3"])
    return w.astype(matmul_dtype), b


# ----------------------------------------------------------------------- wrapper
@partial(jax.jit, static_argnames=("n_data", "n_latent", "n_hidden", "batch_tile"))
def mdvae_forward(x, eps, w_packed, b_packed, *, n_data, n_latent, n_hidden,
                  batch_tile=512):
    """MDVAE forward in one batch-gridded Pallas call. Returns (recon, mean, log_var)."""
    B = x.shape[0]
    L = n_latent
    # layout invariants of the packed slabs (review correctness concern)
    assert n_hidden <= LANE and L <= n_data and n_data + L <= HALF

    # Tile: multiple of 8 rows, capped so there are >= 2 grid steps whenever possible
    # (second v7x TensorCore), defaulting to 512 rows (sweep 256/512/1024 if desired).
    tb = max(8, min(batch_tile, _round_up(-(-B // 2), 8)))
    Bp = _round_up(B, tb)

    # ONE lane-dense input slab: x in lanes [0,n_data), eps in lanes [HALF,HALF+L).
    xin = jnp.zeros((Bp, LANE), jnp.float32)
    xin = xin.at[:B, :n_data].set(x)
    xin = xin.at[:B, HALF:HALF + L].set(eps)

    batch_spec = pl.BlockSpec((tb, LANE), lambda i: (i, 0))
    w_spec = pl.BlockSpec((N_WSLOTS, LANE, LANE), lambda i: (0, 0, 0))   # VMEM-resident
    b_spec = pl.BlockSpec((N_WSLOTS, 1, LANE), lambda i: (0, 0, 0))      # VMEM-resident

    flops = 2 * B * (n_data * n_hidden + n_hidden * n_hidden
                     + n_hidden * 2 * L + L * n_hidden
                     + n_hidden * n_hidden + n_hidden * n_data)
    bytes_accessed = (2 * Bp * LANE * 4                                  # in + out slabs
                      + w_packed.size * w_packed.dtype.itemsize
                      + b_packed.size * 4)

    out = pl.pallas_call(
        partial(_mdvae_kernel, n_latent=L),
        grid=(Bp // tb,),
        in_specs=[batch_spec, w_spec, b_spec],
        out_specs=batch_spec,
        out_shape=jax.ShapeDtypeStruct((Bp, LANE), jnp.float32),
        compiler_params=pltpu.CompilerParams(dimension_semantics=("parallel",)),
        cost_estimate=pl.CostEstimate(flops=flops,
                                      transcendentals=B * L,
                                      bytes_accessed=bytes_accessed),
    )(xin, w_packed, b_packed)

    mean = out[:B, :L]
    log_var = out[:B, HALF:HALF + L]
    recon = out[:B, HALF + L:HALF + L + n_data]
    return recon, mean, log_var


# ------------------------------------------------------------------ init & reference
def init_params(key, n_data, n_latent, n_hidden):
    """Deterministic synthetic parameters (PyTorch-Linear-like uniform init)."""
    def linear(key, fan_in, fan_out):
        kw, kb = jax.random.split(key)
        bound = 1.0 / math.sqrt(fan_in)
        w = jax.random.uniform(kw, (fan_in, fan_out), jnp.float32, -bound, bound)
        b = jax.random.uniform(kb, (fan_out,), jnp.float32, -bound, bound)
        return w, b

    keys = jax.random.split(key, 7)
    p = {}
    p["w1"], p["b1"] = linear(keys[0], n_data, n_hidden)
    p["w2"], p["b2"] = linear(keys[1], n_hidden, n_hidden)
    p["wm"], p["bm"] = linear(keys[2], n_hidden, n_latent)
    p["wv"], p["bv"] = linear(keys[3], n_hidden, n_latent)
    p["wd1"], p["bd1"] = linear(keys[4], n_latent, n_hidden)
    p["wd2"], p["bd2"] = linear(keys[5], n_hidden, n_hidden)
    p["wd3"], p["bd3"] = linear(keys[6], n_hidden, n_data)
    return p


def mdvae_reference(x, eps, p):
    """Plain-JAX f32 reference mirroring the PyTorch forward (eps supplied explicitly)."""
    lrelu = lambda v: jnp.where(v >= 0, v, NEG_SLOPE * v)
    h = lrelu(x @ p["w1"] + p["b1"])
    h = lrelu(h @ p["w2"] + p["b2"])
    mean = h @ p["wm"] + p["bm"]
    log_var = h @ p["wv"] + p["bv"]
    z = mean + jnp.exp(0.5 * log_var) * eps
    d = lrelu(z @ p["wd1"] + p["bd1"])
    d = lrelu(d @ p["wd2"] + p["bd2"])
    recon = d @ p["wd3"] + p["bd3"]
    return recon, mean, log_var


if __name__ == "__main__":
    # Module defaults: n_data=32 -> n_hidden=ceil(0.6*32)=20, n_latent=ceil(0.3*32)=10.
    # batch=256 gives a 2-step "parallel" grid to exercise pipelining / megacore.
    batch = 256
    n_data = 32
    n_latent = math.ceil(0.3 * n_data)
    n_hidden = math.ceil(0.6 * n_data)
    assert not (n_latent > n_hidden or n_latent > n_data)

    key = jax.random.PRNGKey(0)
    k_x, k_eps, k_par = jax.random.split(key, 3)

    x = jax.random.normal(k_x, (batch, n_data), jnp.float32)
    eps = jax.random.normal(k_eps, (batch, n_latent), jnp.float32)
    params = init_params(k_par, n_data, n_latent, n_hidden)

    w_packed, b_packed = pack_params(params, n_data, n_latent, n_hidden,
                                     matmul_dtype=jnp.bfloat16)

    recon, mean, log_var = mdvae_forward(
        x, eps, w_packed, b_packed,
        n_data=n_data, n_latent=n_latent, n_hidden=n_hidden)
    jax.block_until_ready((recon, mean, log_var))

    # bf16 matmul operands (f32 accumulation) -> relaxed tolerance vs. f32 reference.
    r_ref, m_ref, lv_ref = mdvae_reference(x, eps, params)
    assert recon.shape == (batch, n_data)
    assert mean.shape == (batch, n_latent) and log_var.shape == (batch, n_latent)
    assert jnp.allclose(recon, r_ref, atol=5e-2, rtol=5e-2)
    assert jnp.allclose(mean, m_ref, atol=5e-2, rtol=5e-2)
    assert jnp.allclose(log_var, lv_ref, atol=5e-2, rtol=5e-2)

    print("KERNEL_OK")
</pallas_src>

<mosaic_0001>
module attributes {stable_mosaic.version = 11 : i64} {
  func.func @_mdvae_kernel(%arg0: i32, %arg1: memref<128x128xf32, #tpu.memory_space<vmem>>, %arg2: memref<6x128x128xbf16, #tpu.memory_space<vmem>>, %arg3: memref<6x1x128xf32, #tpu.memory_space<vmem>>, %arg4: memref<128x128xf32, #tpu.memory_space<vmem>>) attributes {dimension_semantics = [#tpu.dimension_semantics<parallel>], iteration_bounds = array<i64: 2>, scalar_prefetch = 0 : i64, scratch_operands = 0 : i64, tpu.core_type = #tpu.core_type<tc>, window_params = [{transform_indices = @transform_0, window_bounds = array<i64: 128, 128>}, {pipeline_mode = #tpu.pipeline_mode<synchronous>, transform_indices = @transform_1, window_bounds = array<i64: 6, 128, 128>}, {pipeline_mode = #tpu.pipeline_mode<synchronous>, transform_indices = @transform_2, window_bounds = array<i64: 6, 1, 128>}, {transform_indices = @transform_3, window_bounds = array<i64: 128, 128>}]} {
    %c0 = arith.constant 0 : index
    %c0_0 = arith.constant 0 : index
    %0 = vector.load %arg1[%c0, %c0_0] : memref<128x128xf32, #tpu.memory_space<vmem>>, vector<128x128xf32>
    %c64_i32 = arith.constant 64 : i32
    %1 = tpu.dynamic_rotate %0 by %c64_i32 dim 1 : vector<128x128xf32>, i32 -> vector<128x128xf32>
    %2 = arith.truncf %0 : vector<128x128xf32> to vector<128x128xbf16>
    %c0_1 = arith.constant 0 : index
    %c0_2 = arith.constant 0 : index
    %c0_3 = arith.constant 0 : index
    %3 = vector.load %arg2[%c0_1, %c0_2, %c0_3] : memref<6x128x128xbf16, #tpu.memory_space<vmem>>, vector<1x128x128xbf16>
    %4 = vector.shape_cast %3 : vector<1x128x128xbf16> to vector<128x128xbf16>
    %cst = arith.constant dense<0.000000e+00> : vector<128x128xf32>
    %5 = tpu.matmul %2, %4, %cst {dimension_numbers = #tpu.dot_dimension_numbers<[1], [0], [0], [1], [0, 0, 1, 1], [], []>} : vector<128x128xbf16>, vector<128x128xbf16>, vector<128x128xf32> -> vector<128x128xf32>
    %c0_4 = arith.constant 0 : index
    %c0_5 = arith.constant 0 : index
    %c0_6 = arith.constant 0 : index
    %6 = vector.load %arg3[%c0_4, %c0_5, %c0_6] : memref<6x1x128xf32, #tpu.memory_space<vmem>>, vector<1x1x128xf32>
    %7 = vector.shape_cast %6 : vector<1x1x128xf32> to vector<1x128xf32>
    %8 = vector.broadcast %7 : vector<1x128xf32> to vector<128x128xf32>
    %9 = arith.addf %5, %8 : vector<128x128xf32>
    %cst_7 = arith.constant 0.000000e+00 : f32
    %10 = vector.broadcast %cst_7 : f32 to vector<128x128xf32>
    %11 = arith.cmpf oge, %9, %10 : vector<128x128xf32>
    %cst_8 = arith.constant 0.00999999977 : f32
    %12 = vector.broadcast %cst_8 : f32 to vector<128x128xf32>
    %13 = arith.mulf %12, %9 : vector<128x128xf32>
    %14 = arith.select %11, %9, %13 : vector<128x128xi1>, vector<128x128xf32>
    %15 = arith.truncf %14 : vector<128x128xf32> to vector<128x128xbf16>
    %c1 = arith.constant 1 : index
    %c0_9 = arith.constant 0 : index
    %c0_10 = arith.constant 0 : index
    %16 = vector.load %arg2[%c1, %c0_9, %c0_10] : memref<6x128x128xbf16, #tpu.memory_space<vmem>>, vector<1x128x128xbf16>
    %17 = vector.shape_cast %16 : vector<1x128x128xbf16> to vector<128x128xbf16>
    %cst_11 = arith.constant dense<0.000000e+00> : vector<128x128xf32>
    %18 = tpu.matmul %15, %17, %cst_11 {dimension_numbers = #tpu.dot_dimension_numbers<[1], [0], [0], [1], [0, 0, 1, 1], [], []>} : vector<128x128xbf16>, vector<128x128xbf16>, vector<128x128xf32> -> vector<128x128xf32>
    %c1_12 = arith.constant 1 : index
    %c0_13 = arith.constant 0 : index
    %c0_14 = arith.constant 0 : index
    %19 = vector.load %arg3[%c1_12, %c0_13, %c0_14] : memref<6x1x128xf32, #tpu.memory_space<vmem>>, vector<1x1x128xf32>
    %20 = vector.shape_cast %19 : vector<1x1x128xf32> to vector<1x128xf32>
    %21 = vector.broadcast %20 : vector<1x128xf32> to vector<128x128xf32>
    %22 = arith.addf %18, %21 : vector<128x128xf32>
    %cst_15 = arith.constant 0.000000e+00 : f32
    %23 = vector.broadcast %cst_15 : f32 to vector<128x128xf32>
    %24 = arith.cmpf oge, %22, %23 : vector<128x128xf32>
    %cst_16 = arith.constant 0.00999999977 : f32
    %25 = vector.broadcast %cst_16 : f32 to vector<128x128xf32>
    %26 = arith.mulf %25, %22 : vector<128x128xf32>
    %27 = arith.select %24, %22, %26 : vector<128x128xi1>, vector<128x128xf32>
    %28 = arith.truncf %27 : vector<128x128xf32> to vector<128x128xbf16>
    %c2 = arith.constant 2 : index
    %c0_17 = arith.constant 0 : index
    %c0_18 = arith.constant 0 : index
    %29 = vector.load %arg2[%c2, %c0_17, %c0_18] : memref<6x128x128xbf16, #tpu.memory_space<vmem>>, vector<1x128x128xbf16>
    %30 = vector.shape_cast %29 : vector<1x128x128xbf16> to vector<128x128xbf16>
    %cst_19 = arith.constant dense<0.000000e+00> : vector<128x128xf32>
    %31 = tpu.matmul %28, %30, %cst_19 {dimension_numbers = #tpu.dot_dimension_numbers<[1], [0], [0], [1], [0, 0, 1, 1], [], []>} : vector<128x128xbf16>, vector<128x128xbf16>, vector<128x128xf32> -> vector<128x128xf32>
    %c2_20 = arith.constant 2 : index
    %c0_21 = arith.constant 0 : index
    %c0_22 = arith.constant 0 : index
    %32 = vector.load %arg3[%c2_20, %c0_21, %c0_22] : memref<6x1x128xf32, #tpu.memory_space<vmem>>, vector<1x1x128xf32>
    %33 = vector.shape_cast %32 : vector<1x1x128xf32> to vector<1x128xf32>
    %34 = vector.broadcast %33 : vector<1x128xf32> to vector<128x128xf32>
    %35 = arith.addf %31, %34 : vector<128x128xf32>
    %c64_i32_23 = arith.constant 64 : i32
    %36 = tpu.dynamic_rotate %35 by %c64_i32_23 dim 1 : vector<128x128xf32>, i32 -> vector<128x128xf32>
    %37 = tpu.iota {dimensions = array<i32: 1>} : vector<128x128xi32>
    %c10_i32 = arith.constant 10 : i32
    %38 = vector.broadcast %c10_i32 : i32 to vector<128x128xi32>
    %39 = arith.cmpi slt, %37, %38 : vector<128x128xi32>
    %cst_24 = arith.constant 0.000000e+00 : f32
    %40 = vector.broadcast %cst_24 : f32 to vector<128x128xf32>
    %41 = arith.select %39, %36, %40 : vector<128x128xi1>, vector<128x128xf32>
    %cst_25 = arith.constant 5.000000e-01 : f32
    %42 = vector.broadcast %cst_25 : f32 to vector<128x128xf32>
    %43 = arith.mulf %42, %41 : vector<128x128xf32>
    %44 = math.exp %43 : vector<128x128xf32>
    %45 = arith.mulf %44, %1 : vector<128x128xf32>
    %46 = arith.addf %35, %45 : vector<128x128xf32>
    %47 = arith.truncf %46 : vector<128x128xf32> to vector<128x128xbf16>
    %c3 = arith.constant 3 : index
    %c0_26 = arith.constant 0 : index
    %c0_27 = arith.constant 0 : index
    %48 = vector.load %arg2[%c3, %c0_26, %c0_27] : memref<6x128x128xbf16, #tpu.memory_space<vmem>>, vector<1x128x128xbf16>
    %49 = vector.shape_cast %48 : vector<1x128x128xbf16> to vector<128x128xbf16>
    %cst_28 = arith.constant dense<0.000000e+00> : vector<128x128xf32>
    %50 = tpu.matmul %47, %49, %cst_28 {dimension_numbers = #tpu.dot_dimension_numbers<[1], [0], [0], [1], [0, 0, 1, 1], [], []>} : vector<128x128xbf16>, vector<128x128xbf16>, vector<128x128xf32> -> vector<128x128xf32>
    %c3_29 = arith.constant 3 : index
    %c0_30 = arith.constant 0 : index
    %c0_31 = arith.constant 0 : index
    %51 = vector.load %arg3[%c3_29, %c0_30, %c0_31] : memref<6x1x128xf32, #tpu.memory_space<vmem>>, vector<1x1x128xf32>
    %52 = vector.shape_cast %51 : vector<1x1x128xf32> to vector<1x128xf32>
    %53 = vector.broadcast %52 : vector<1x128xf32> to vector<128x128xf32>
    %54 = arith.addf %50, %53 : vector<128x128xf32>
    %cst_32 = arith.constant 0.000000e+00 : f32
    %55 = vector.broadcast %cst_32 : f32 to vector<128x128xf32>
    %56 = arith.cmpf oge, %54, %55 : vector<128x128xf32>
    %cst_33 = arith.constant 0.00999999977 : f32
    %57 = vector.broadcast %cst_33 : f32 to vector<128x128xf32>
    %58 = arith.mulf %57, %54 : vector<128x128xf32>
    %59 = arith.select %56, %54, %58 : vector<128x128xi1>, vector<128x128xf32>
    %60 = arith.truncf %59 : vector<128x128xf32> to vector<128x128xbf16>
    %c4 = arith.constant 4 : index
    %c0_34 = arith.constant 0 : index
    %c0_35 = arith.constant 0 : index
    %61 = vector.load %arg2[%c4, %c0_34, %c0_35] : memref<6x128x128xbf16, #tpu.memory_space<vmem>>, vector<1x128x128xbf16>
    %62 = vector.shape_cast %61 : vector<1x128x128xbf16> to vector<128x128xbf16>
    %cst_36 = arith.constant dense<0.000000e+00> : vector<128x128xf32>
    %63 = tpu.matmul %60, %62, %cst_36 {dimension_numbers = #tpu.dot_dimension_numbers<[1], [0], [0], [1], [0, 0, 1, 1], [], []>} : vector<128x128xbf16>, vector<128x128xbf16>, vector<128x128xf32> -> vector<128x128xf32>
    %c4_37 = arith.constant 4 : index
    %c0_38 = arith.constant 0 : index
    %c0_39 = arith.constant 0 : index
    %64 = vector.load %arg3[%c4_37, %c0_38, %c0_39] : memref<6x1x128xf32, #tpu.memory_space<vmem>>, vector<1x1x128xf32>
    %65 = vector.shape_cast %64 : vector<1x1x128xf32> to vector<1x128xf32>
    %66 = vector.broadcast %65 : vector<1x128xf32> to vector<128x128xf32>
    %67 = arith.addf %63, %66 : vector<128x128xf32>
    %cst_40 = arith.constant 0.000000e+00 : f32
    %68 = vector.broadcast %cst_40 : f32 to vector<128x128xf32>
    %69 = arith.cmpf oge, %67, %68 : vector<128x128xf32>
    %cst_41 = arith.constant 0.00999999977 : f32
    %70 = vector.broadcast %cst_41 : f32 to vector<128x128xf32>
    %71 = arith.mulf %70, %67 : vector<128x128xf32>
    %72 = arith.select %69, %67, %71 : vector<128x128xi1>, vector<128x128xf32>
    %73 = arith.truncf %72 : vector<128x128xf32> to vector<128x128xbf16>
    %c5 = arith.constant 5 : index
    %c0_42 = arith.constant 0 : index
    %c0_43 = arith.constant 0 : index
    %74 = vector.load %arg2[%c5, %c0_42, %c0_43] : memref<6x128x128xbf16, #tpu.memory_space<vmem>>, vector<1x128x128xbf16>
    %75 = vector.shape_cast %74 : vector<1x128x128xbf16> to vector<128x128xbf16>
    %cst_44 = arith.constant dense<0.000000e+00> : vector<128x128xf32>
    %76 = tpu.matmul %73, %75, %cst_44 {dimension_numbers = #tpu.dot_dimension_numbers<[1], [0], [0], [1], [0, 0, 1, 1], [], []>} : vector<128x128xbf16>, vector<128x128xbf16>, vector<128x128xf32> -> vector<128x128xf32>
    %c5_45 = arith.constant 5 : index
    %c0_46 = arith.constant 0 : index
    %c0_47 = arith.constant 0 : index
    %77 = vector.load %arg3[%c5_45, %c0_46, %c0_47] : memref<6x1x128xf32, #tpu.memory_space<vmem>>, vector<1x1x128xf32>
    %78 = vector.shape_cast %77 : vector<1x1x128xf32> to vector<1x128xf32>
    %79 = vector.broadcast %78 : vector<1x128xf32> to vector<128x128xf32>
    %80 = arith.addf %76, %79 : vector<128x128xf32>
    %81 = arith.addf %35, %80 : vector<128x128xf32>
    %c0_48 = arith.constant 0 : index
    %c0_49 = arith.constant 0 : index
    %82 = vector.load %arg4[%c0_48, %c0_49] : memref<128x128xf32, #tpu.memory_space<vmem>>, vector<128x128xf32>
    tpu.vector_store %arg4[%c0_48, %c0_49], %81 {strides = array<i32>} : memref<128x128xf32, #tpu.memory_space<vmem>>, vector<128x128xf32>,
    return
  }
  func.func @transform_0(%arg0: i32) -> (i32, i32) {
    %c0_i32 = arith.constant 0 : i32
    %c0_i32_0 = arith.constant 0 : i32
    return %arg0, %c0_i32 : i32, i32
  }
  func.func @transform_1(%arg0: i32) -> (i32, i32, i32) {
    %c0_i32 = arith.constant 0 : i32
    %c0_i32_0 = arith.constant 0 : i32
    %c0_i32_1 = arith.constant 0 : i32
    %c0_i32_2 = arith.constant 0 : i32
    return %c0_i32, %c0_i32_0, %c0_i32_1 : i32, i32, i32
  }
  func.func @transform_2(%arg0: i32) -> (i32, i32, i32) {
    %c0_i32 = arith.constant 0 : i32
    %c0_i32_0 = arith.constant 0 : i32
    %c0_i32_1 = arith.constant 0 : i32
    %c0_i32_2 = arith.constant 0 : i32
    return %c0_i32, %c0_i32_0, %c0_i32_1 : i32, i32, i32
  }
  func.func @transform_3(%arg0: i32) -> (i32, i32) {
    %c0_i32 = arith.constant 0 : i32
    %c0_i32_0 = arith.constant 0 : i32
    return %arg0, %c0_i32 : i32, i32
  }
}

</mosaic_0001>

<bundles_post_ra>
// kernel: mdvae_forward.1
= control target key start
LH: loop header
LB: loop body
LE: loop exit
PB: predicated region body
PF: predicated region fallthrough
CT: control target
= control target key end

     0   :  { %s1821_s12 = smov 0   ;;  %s2362_s0 = inlined_call_operand.vmem [shape: f32[256,128], index: 0, kind: input, shape index: {}]   ;;  %s2363_s1 = inlined_call_operand.vmem [shape: bf16[6,128,128], index: 1, kind: input, shape index: {}]   ;;  %s2364_s2 = inlined_call_operand.vmem [shape: f32[6,1,128], index: 2, kind: input, shape index: {}]   ;;  %s2365_s3 = inlined_call_operand.vmem [shape: f32[256,128], index: 3, kind: output, shape index: {}]  }
   0x1 LB: > { %s1393_s13 = sadd.s32 4294967295, %s1798_s12   ;;  %p1397_p0 = scmp.ge.s32.totalorder %s1798_s12, 1  ;;  %s1798_s12 = sphi %s1821_s12, %s13_s12  }
   0x2   : > { %p138_p1 = scmp.lt.s32.totalorder %s1798_s12, 3 }
   0x4   : > { %p139_p2 = pnand %p1397_p0, %p138_p1 }
   0x5   : > { %s1398_s20 = sshll.u32 (!%p139_p2), %s1393_s13, 4  ;;  %s1800_s22 = smov (!%p139_p2), 64  }
   0x6   : > { %142 = sbr.rel (%p139_p2) target bundleno = 1139 (0x473), region = 32  ;;  %p163_p3 = scmp.lt.s32.totalorder (!%p139_p2), %s1398_s20, 31 }
   0xb   : > { %v1688_v0 = vld [vmem:[%s2363_s1 + $0x38] sm:$0xff]  ;;  %v1687_v1 = vld [vmem:[%s2363_s1 + $0x30] sm:$0xff]  ;;  %v1686_v2 = vld [vmem:[%s2363_s1 + $0x28] sm:$0xff]  ;;  %s2367_s20 = smov (!%p163_p3, %s1398_s20), 31 }
   0xc   : > { %298 = vmatpush.bf16.msra.mxu0 %v1688_v0  ;;  %1729 = vmatpush.bf16.msra.mxu2 %v1688_v0  ;;  %v1685_v3 = vld [vmem:[%s2363_s1 + $0x20] sm:$0xff]  ;;  %v1684_v4 = vld [vmem:[%s2363_s1 + $0x18] sm:$0xff]  ;;  %v1683_v5 = vld [vmem:[%s2363_s1 + $0x10] sm:$0xff]  ;;  %s1399_s27 = sshll.u32 %s2367_s20, 3 }
   0xd   : > { %v1682_v6 = vld [vmem:[%s2363_s1 + $0x8] sm:$0xff]  ;;  %s1858_s5 = scalar_lea.vmem %s2362_s0, %s1399_s27  ;;  %v1681_v7 = vld [vmem:[%s2363_s1] sm:$0xff]  ;;  %v1696_v20 = vld [vmem:[%s2363_s1 + $0x78] sm:$0xff]  ;;  %s2310_s7 = scalar_lea.vmem %s2365_s3, %s1399_s27 }
   0xe   : > { %v1864_v8 = vld [vmem:[%s1858_s5] sm:$0xff]  ;;  %v1867_v9 = vld [vmem:[%s1858_s5 + $0x8] sm:$0xff]  ;;  %v1880_v14 = vld [vmem:[%s1858_s5 + $0x10] sm:$0xff]  ;;  %473 = vmatpush.bf16.msra.mxu1 %v1696_v20  ;;  %1737 = vmatpush.bf16.msra.mxu3 %v1696_v20 }
   0xf   : > { %v222_v10 = vpack.c.bf16 %v1867_v9, %v1864_v8  ;;  %v1872_v11 = vld [vmem:[%s1858_s5 + $0x40] sm:$0xff]  ;;  %v1875_v12 = vld [vmem:[%s1858_s5 + $0x48] sm:$0xff]  ;;  %v1883_v15 = vld [vmem:[%s1858_s5 + $0x18] sm:$0xff]  ;;  %190 = vrot.lane.b32.xlu1 %v1864_v8, %s1800_s22 }
  0x10   : > { %299 = vmatpush.bf16.msra.mxu0 %v1687_v1  ;;  %1730 = vmatpush.bf16.msra.mxu2 %v1687_v1  ;;  %v226_v13 = vpack.c.bf16 %v1875_v12, %v1872_v11  ;;  %v223_v16 = vpack.c.bf16 %v1883_v15, %v1880_v14  ;;  %v1888_v17 = vld [vmem:[%s1858_s5 + $0x50] sm:$0xff]  ;;  %v1891_v18 = vld [vmem:[%s1858_s5 + $0x58] sm:$0xff]  ;;  %v1694_v22 = vld [vmem:[%s2363_s1 + $0x68] sm:$0xff] }
  0x11   : > { %v227_v19 = vpack.c.bf16 %v1891_v18, %v1888_v17  ;;  %v1695_v21 = vld [vmem:[%s2363_s1 + $0x70] sm:$0xff]  ;;  %v1905_v23 = vld [vmem:[%s1858_s5 + $0x20] sm:$0xff]  ;;  %v1908_v24 = vld [vmem:[%s1858_s5 + $0x28] sm:$0xff] }
  0x12   : > { %474 = vmatpush.bf16.msra.mxu1 %v1695_v21  ;;  %1738 = vmatpush.bf16.msra.mxu3 %v1695_v21  ;;  %v1911_v25 = vld [vmem:[%s1858_s5 + $0x60] sm:$0xff]  ;;  %v1914_v26 = vld [vmem:[%s1858_s5 + $0x68] sm:$0xff]  ;;  %v224_v28 = vpack.c.bf16 %v1908_v24, %v1905_v23  ;;  %v1924_v30 = vld [vmem:[%s1858_s5 + $0x30] sm:$0xff] }
  0x13   : > { %v1693_v27 = vld [vmem:[%s2363_s1 + $0x60] sm:$0xff]  ;;  %v228_v29 = vpack.c.bf16 %v1914_v26, %v1911_v25  ;;  %v1927_v31 = vld [vmem:[%s1858_s5 + $0x38] sm:$0xff]  ;;  %v1930_v32 = vld [vmem:[%s1858_s5 + $0x70] sm:$0xff] }
  0x14   : > { %300 = vmatpush.bf16.msra.mxu0 %v1686_v2  ;;  %1731 = vmatpush.bf16.msra.mxu2 %v1686_v2  ;;  %v1933_v33 = vld [vmem:[%s1858_s5 + $0x78] sm:$0xff]  ;;  %v225_v34 = vpack.c.bf16 %v1927_v31, %v1924_v30  ;;  %v1691_v37 = vld [vmem:[%s2363_s1 + $0x50] sm:$0xff]  ;;  %v1690_v38 = vld [vmem:[%s2363_s1 + $0x48] sm:$0xff] }
  0x15   : > { %v229_v35 = vpack.c.bf16 %v1933_v33, %v1930_v32  ;;  %v1692_v36 = vld [vmem:[%s2363_s1 + $0x58] sm:$0xff]  ;;  %v1689_v39 = vld [vmem:[%s2363_s1 + $0x40] sm:$0xff]  ;;  %v1703_v21 = vld [vmem:[%s2363_s1 + $0xb0] sm:$0xff] }
  0x16   : > { %475 = vmatpush.bf16.msra.mxu1 %v1694_v22  ;;  %1739 = vmatpush.bf16.msra.mxu3 %v1694_v22  ;;  %v1954_v41 = vld [vmem:[%s2364_s2] ss:$0 sm:$0xff] }
  0x17   : > { %192 = vrot.lane.b32.xlu1 %v1867_v9, %s1800_s22 }
  0x18   : > { %301 = vmatpush.bf16.msra.mxu0 %v1685_v3  ;;  %1732 = vmatpush.bf16.msra.mxu2 %v1685_v3 }
  0x1a   : > { %476 = vmatpush.bf16.msra.mxu1 %v1693_v27  ;;  %1740 = vmatpush.bf16.msra.mxu3 %v1693_v27 }
  0x1c   : > { %302 = vmatpush.bf16.msra.mxu0 %v1684_v4  ;;  %1733 = vmatpush.bf16.msra.mxu2 %v1684_v4 }
  0x1e   : > { %477 = vmatpush.bf16.msra.mxu1 %v1692_v36  ;;  %1741 = vmatpush.bf16.msra.mxu3 %v1692_v36 }
  0x1f   : > { %196 = vrot.lane.b32.xlu1 %v1883_v15, %s1800_s22 }
  0x20   : > { %303 = vmatpush.bf16.msra.mxu0 %v1683_v5  ;;  %1734 = vmatpush.bf16.msra.mxu2 %v1683_v5 }
  0x22   : > { %478 = vmatpush.bf16.msra.mxu1 %v1691_v37  ;;  %1742 = vmatpush.bf16.msra.mxu3 %v1691_v37 }
  0x24   : > { %304 = vmatpush.bf16.msra.mxu0 %v1682_v6  ;;  %1735 = vmatpush.bf16.msra.mxu2 %v1682_v6 }
  0x26   : > { %479 = vmatpush.bf16.msra.mxu1 %v1690_v38  ;;  %1743 = vmatpush.bf16.msra.mxu3 %v1690_v38 }
  0x27   : > { %198 = vrot.lane.b32.xlu1 %v1905_v23, %s1800_s22 }
  0x28   : > { %305 = vmatpush.bf16.msra.mxu0 %v1681_v7  ;;  %1736 = vmatpush.bf16.msra.mxu2 %v1681_v7 }
  0x2a   : > { %480 = vmatpush.bf16.msra.mxu1 %v1689_v39  ;;  %1744 = vmatpush.bf16.msra.mxu3 %v1689_v39  ;;  %v1701_v39 = vld [vmem:[%s2363_s1 + $0xa0] sm:$0xff] }
  0x2b   : > { %306 = vmatmul.bf16.vlgmr.msra.gmra.mxu0 %v222_v10  ;;  %326 = vmatmul.bf16.vlgmr.msra.gmra.mxu2 %v226_v13 }
  0x3b   : > { %311 = vmatmul.bf16.gmra.mxu0 %v223_v16  ;;  %331 = vmatmul.bf16.gmra.mxu2 %v227_v19  ;;  %v1704_v16 = vld [vmem:[%s2363_s1 + $0xb8] sm:$0xff] }
  0x3c   : > { %648 = vmatpush.bf16.msrb.mxu2 %v1704_v16 }
  0x40   : > { %649 = vmatpush.bf16.msrb.mxu2 %v1703_v21 }
  0x4b   : > { %316 = vmatmul.bf16.gmra.mxu0 %v224_v28  ;;  %336 = vmatmul.bf16.gmra.mxu2 %v228_v29 }
  0x5b   : > { %321 = vmatmul.bf16.gmra.mxu0 %v225_v34  ;;  %341 = vmatmul.bf16.gmra.mxu2 %v229_v35  ;;  %v1702_v34 = vld [vmem:[%s2363_s1 + $0xa8] sm:$0xff] }
  0x5c   : > { %650 = vmatpush.bf16.msrb.mxu2 %v1702_v34 }
  0x60   : > { %651 = vmatpush.bf16.msrb.mxu2 %v1701_v39 }
  0xa8   : > { %v307_v40 = vpop.f32.mrf.mxu0 }
  0xa9   : > { %v308_v42 = vadd.f32 %v1954_v41, %v307_v40 }
  0xab   : > { %v363_v45 = vmul.f32 0.01, %v308_v42  ;;  %vm347_vm0 = vcmp.ge.f32.partialorder %v308_v42, 0.0 }
  0xad   : > { %v379_v49 = vsel %vm347_vm0, %v308_v42, %v363_v45 }
  0xae   : > { %v327_v43 = vpop.f32.mrf.mxu2 }
  0xaf   : > { %v328_v48 = vadd.f32 %v1954_v41, %v327_v43 }
  0xb0   : > { %v309_v44 = vpop.f32.mrf.mxu0 }
  0xb1   : > { %v310_v46 = vadd.f32 %v1954_v41, %v309_v44  ;;  %v371_v53 = vmul.f32 0.01, %v328_v48  ;;  %vm355_vm2 = vcmp.ge.f32.partialorder %v328_v48, 0.0 }
  0xb3   : > { %v364_v47 = vmul.f32 0.01, %v310_v46  ;;  %vm348_vm1 = vcmp.ge.f32.partialorder %v310_v46, 0.0  ;;  %v387_v57 = vsel %vm355_vm2, %v328_v48, %v371_v53 }
  0xb5   : > { %v380_v50 = vsel %vm348_vm1, %v310_v46, %v364_v47  ;;  %v1700_v47 = vld [vmem:[%s2363_s1 + $0x98] sm:$0xff] }
  0xb6   : > { %v395_v51 = vpack.c.bf16 %v380_v50, %v379_v49  ;;  %v329_v52 = vpop.f32.mrf.mxu2  ;;  %652 = vmatpush.bf16.msrb.mxu2 %v1700_v47 }
  0xb7   : > { %v330_v54 = vadd.f32 %v1954_v41, %v329_v52  ;;  %v1699_v52 = vld [vmem:[%s2363_s1 + $0x90] sm:$0xff] }
  0xb8   : > { %v312_v55 = vpop.f32.mrf.mxu0  ;;  %481 = vmatmul.bf16.vlgmr.msra.gmra.mxu1 %v395_v51 }
  0xb9   : > { %v372_v56 = vmul.f32 0.01, %v330_v54  ;;  %vm356_vm3 = vcmp.ge.f32.partialorder %v330_v54, 0.0  ;;  %v313_v60 = vadd.f32 %v1954_v41, %v312_v55 }
  0xba   : > { %653 = vmatpush.bf16.msrb.mxu2 %v1699_v52 }
  0xbb   : > { %v388_v58 = vsel %vm356_vm3, %v330_v54, %v372_v56  ;;  %v365_v63 = vmul.f32 0.01, %v313_v60  ;;  %vm349_vm4 = vcmp.ge.f32.partialorder %v313_v60, 0.0 }
  0xbc   : > { %v399_v59 = vpack.c.bf16 %v388_v58, %v387_v57 }
  0xbd   : > { %v381_v3 = vsel %vm349_vm4, %v313_v60, %v365_v63 }
  0xbe   : > { %v332_v61 = vpop.f32.mrf.mxu2  ;;  %501 = vmatmul.bf16.vlgmr.msra.gmra.mxu3 %v399_v59 }
  0xbf   : > { %v333_v1 = vadd.f32 %v1954_v41, %v332_v61 }
  0xc0   : > { %v314_v62 = vpop.f32.mrf.mxu0 }
  0xc1   : > { %v315_v0 = vadd.f32 %v1954_v41, %v314_v62  ;;  %v373_v5 = vmul.f32 0.01, %v333_v1  ;;  %vm357_vm6 = vcmp.ge.f32.partialorder %v333_v1, 0.0 }
  0xc3   : > { %v366_v2 = vmul.f32 0.01, %v315_v0  ;;  %vm350_vm5 = vcmp.ge.f32.partialorder %v315_v0, 0.0  ;;  %v389_v20 = vsel %vm357_vm6, %v333_v1, %v373_v5 }
  0xc5   : > { %v382_v4 = vsel %vm350_vm5, %v315_v0, %v366_v2 }
  0xc6   : > { %v396_v6 = vpack.c.bf16 %v382_v4, %v381_v3  ;;  %v334_v7 = vpop.f32.mrf.mxu2 }
  0xc7   : > { %v335_v10 = vadd.f32 %v1954_v41, %v334_v7 }
  0xc8   : > { %v317_v13 = vpop.f32.mrf.mxu0  ;;  %486 = vmatmul.bf16.gmra.mxu1 %v396_v6 }
  0xc9   : > { %v374_v19 = vmul.f32 0.01, %v335_v10  ;;  %vm358_vm7 = vcmp.ge.f32.partialorder %v335_v10, 0.0  ;;  %v318_v28 = vadd.f32 %v1954_v41, %v317_v13  ;;  %v1697_v13 = vld [vmem:[%s2363_s1 + $0x80] sm:$0xff] }
  0xcb   : > { %v390_v22 = vsel %vm358_vm7, %v335_v10, %v374_v19  ;;  %v367_v36 = vmul.f32 0.01, %v318_v28  ;;  %vm351_vm8 = vcmp.ge.f32.partialorder %v318_v28, 0.0  ;;  %v1698_v10 = vld [vmem:[%s2363_s1 + $0x88] sm:$0xff] }
  0xcc   : > { %v400_v27 = vpack.c.bf16 %v390_v22, %v389_v20  ;;  %654 = vmatpush.bf16.msrb.mxu2 %v1698_v10 }
  0xcd   : > { %v383_v42 = vsel %vm351_vm8, %v318_v28, %v367_v36 }
  0xce   : > { %v337_v29 = vpop.f32.mrf.mxu2  ;;  %506 = vmatmul.bf16.gmra.mxu3 %v400_v27 }
  0xcf   : > { %v338_v38 = vadd.f32 %v1954_v41, %v337_v29 }
  0xd0   : > { %v319_v35 = vpop.f32.mrf.mxu0  ;;  %655 = vmatpush.bf16.msrb.mxu2 %v1697_v13 }
  0xd1   : > { %v320_v37 = vadd.f32 %v1954_v41, %v319_v35  ;;  %v375_v44 = vmul.f32 0.01, %v338_v38  ;;  %vm359_vm10 = vcmp.ge.f32.partialorder %v338_v38, 0.0 }
  0xd3   : > { %v368_v40 = vmul.f32 0.01, %v320_v37  ;;  %vm352_vm9 = vcmp.ge.f32.partialorder %v320_v37, 0.0  ;;  %v391_v51 = vsel %vm359_vm10, %v338_v38, %v375_v44 }
  0xd5   : > { %v384_v43 = vsel %vm352_vm9, %v320_v37, %v368_v40 }
  0xd6   : > { %v397_v45 = vpack.c.bf16 %v384_v43, %v383_v42  ;;  %v339_v46 = vpop.f32.mrf.mxu2 }
  0xd7   : > { %v340_v48 = vadd.f32 %v1954_v41, %v339_v46 }
  0xd8   : > { %v322_v49 = vpop.f32.mrf.mxu0  ;;  %491 = vmatmul.bf16.gmra.mxu1 %v397_v45 }
  0xd9   : > { %v376_v50 = vmul.f32 0.01, %v340_v48  ;;  %vm360_vm11 = vcmp.ge.f32.partialorder %v340_v48, 0.0  ;;  %v323_v55 = vadd.f32 %v1954_v41, %v322_v49 }
  0xdb   : > { %v392_v53 = vsel %vm360_vm11, %v340_v48, %v376_v50  ;;  %v369_v58 = vmul.f32 0.01, %v323_v55  ;;  %vm353_vm12 = vcmp.ge.f32.partialorder %v323_v55, 0.0 }
  0xdc   : > { %v401_v54 = vpack.c.bf16 %v392_v53, %v391_v51 }
  0xdd   : > { %v385_v62 = vsel %vm353_vm12, %v323_v55, %v369_v58 }
  0xde   : > { %511 = vmatmul.bf16.gmra.mxu3 %v401_v54  ;;  %v342_v56 = vpop.f32.mrf.mxu2 }
  0xdf   : > { %v343_v60 = vadd.f32 %v1954_v41, %v342_v56 }
  0xe0   : > { %v324_v57 = vpop.f32.mrf.mxu0 }
  0xe1   : > { %v325_v59 = vadd.f32 %v1954_v41, %v324_v57  ;;  %v377_v0 = vmul.f32 0.01, %v343_v60  ;;  %vm361_vm14 = vcmp.ge.f32.partialorder %v343_v60, 0.0 }
  0xe3   : > { %v370_v61 = vmul.f32 0.01, %v325_v59  ;;  %vm354_vm13 = vcmp.ge.f32.partialorder %v325_v59, 0.0  ;;  %v393_v5 = vsel %vm361_vm14, %v343_v60, %v377_v0 }
  0xe5   : > { %v386_v63 = vsel %vm354_vm13, %v325_v59, %v370_v61 }
  0xe6   : > { %v398_v1 = vpack.c.bf16 %v386_v63, %v385_v62  ;;  %v344_v2 = vpop.f32.mrf.mxu2 }
  0xe7   : > { %v345_v3 = vadd.f32 %v1954_v41, %v344_v2  ;;  %v1999_v41 = vld [vmem:[%s2364_s2 + $0x1] ss:$0 sm:$0xff] }
  0xe8   : > { %496 = vmatmul.bf16.gmra.mxu1 %v398_v1 }
  0xe9   : > { %v378_v4 = vmul.f32 0.01, %v345_v3  ;;  %vm362_vm15 = vcmp.ge.f32.partialorder %v345_v3, 0.0 }
  0xeb   : > { %v394_v6 = vsel %vm362_vm15, %v345_v3, %v378_v4 }
  0xec   : > { %v402_v7 = vpack.c.bf16 %v394_v6, %v393_v5 }
  0xee   : > { %516 = vmatmul.bf16.gmra.mxu3 %v402_v7 }
 0x135   : > { %v482_v16 = vpop.f32.mrf.mxu1 }
 0x136   : > { %v483_v19 = vadd.f32 %v1999_v41, %v482_v16 }
 0x138   : > { %v538_v21 = vmul.f32 0.01, %v483_v19  ;;  %vm522_vm0 = vcmp.ge.f32.partialorder %v483_v19, 0.0 }
 0x13a   : > { %v554_v28 = vsel %vm522_vm0, %v483_v19, %v538_v21 }
 0x13d   : > { %v484_v20 = vpop.f32.mrf.mxu1 }
 0x13e   : > { %v485_v22 = vadd.f32 %v1999_v41, %v484_v20 }
 0x140   : > { %vm523_vm1 = vcmp.ge.f32.partialorder %v485_v22, 0.0  ;;  %v539_v27 = vmul.f32 0.01, %v485_v22 }
 0x141   : > { %v502_v48 = vpop.f32.mrf.mxu3 }
 0x142   : > { %v555_v29 = vsel %vm523_vm1, %v485_v22, %v539_v27  ;;  %v503_v62 = vadd.f32 %v1999_v41, %v502_v48 }
 0x143   : > { %v570_v34 = vpack.c.bf16 %v555_v29, %v554_v28 }
 0x144   : > { %v546_v0 = vmul.f32 0.01, %v503_v62  ;;  %vm530_vm8 = vcmp.ge.f32.partialorder %v503_v62, 0.0 }
 0x145   : > { %v487_v35 = vpop.f32.mrf.mxu1  ;;  %656 = vmatmul.bf16.vlgmr.msrb.gmra.mxu2 %v570_v34 }
 0x146   : > { %v488_v8 = vadd.f32 %v1999_v41, %v487_v35  ;;  %v562_v3 = vsel %vm530_vm8, %v503_v62, %v546_v0 }
 0x148   : > { %v540_v37 = vmul.f32 0.01, %v488_v8  ;;  %vm524_vm2 = vcmp.ge.f32.partialorder %v488_v8, 0.0 }
 0x149   : > { %v504_v53 = vpop.f32.mrf.mxu3 }
 0x14a   : > { %v556_v39 = vsel %vm524_vm2, %v488_v8, %v540_v37  ;;  %v505_v63 = vadd.f32 %v1999_v41, %v504_v53 }
 0x14c   : > { %v547_v1 = vmul.f32 0.01, %v505_v63  ;;  %vm531_vm9 = vcmp.ge.f32.partialorder %v505_v63, 0.0 }
 0x14d   : > { %v489_v36 = vpop.f32.mrf.mxu1 }
 0x14e   : > { %v490_v38 = vadd.f32 %v1999_v41, %v489_v36  ;;  %v563_v4 = vsel %vm531_vm9, %v505_v63, %v547_v1 }
 0x14f   : > { %v574_v5 = vpack.c.bf16 %v563_v4, %v562_v3 }
 0x150   : > { %v541_v9 = vmul.f32 0.01, %v490_v38  ;;  %vm525_vm3 = vcmp.ge.f32.partialorder %v490_v38, 0.0 }
 0x151   : > { %v507_v61 = vpop.f32.mrf.mxu3 }
 0x152   : > { %v557_v40 = vsel %vm525_vm3, %v490_v38, %v541_v9  ;;  %v508_v6 = vadd.f32 %v1999_v41, %v507_v61 }
 0x153   : > { %v571_v42 = vpack.c.bf16 %v557_v40, %v556_v39 }
 0x154   : > { %v548_v13 = vmul.f32 0.01, %v508_v6  ;;  %vm532_vm10 = vcmp.ge.f32.partialorder %v508_v6, 0.0 }
 0x155   : > { %v492_v43 = vpop.f32.mrf.mxu1  ;;  %661 = vmatmul.bf16.gmra.mxu2 %v571_v42 }
 0x156   : > { %v493_v44 = vadd.f32 %v1999_v41, %v492_v43  ;;  %v564_v19 = vsel %vm532_vm10, %v508_v6, %v548_v13  ;;  %v1705_v6 = vld [vmem:[%s2363_s1 + $0xc0] sm:$0xff] }
 0x158   : > { %v542_v45 = vmul.f32 0.01, %v493_v44  ;;  %vm526_vm4 = vcmp.ge.f32.partialorder %v493_v44, 0.0 }
 0x159   : > { %v509_v2 = vpop.f32.mrf.mxu3 }
 0x15a   : > { %v558_v49 = vsel %vm526_vm4, %v493_v44, %v542_v45  ;;  %v510_v7 = vadd.f32 %v1999_v41, %v509_v2  ;;  %v2028_v45 = vld [vmem:[%s2364_s2 + $0x2] ss:$0 sm:$0xff] }
 0x15c   : > { %v549_v16 = vmul.f32 0.01, %v510_v7  ;;  %vm533_vm11 = vcmp.ge.f32.partialorder %v510_v7, 0.0 }
 0x15d   : > { %v494_v15 = vpop.f32.mrf.mxu1 }
 0x15e   : > { %v495_v46 = vadd.f32 %v1999_v41, %v494_v15  ;;  %v565_v20 = vsel %vm533_vm11, %v510_v7, %v549_v16 }
 0x15f   : > { %v575_v22 = vpack.c.bf16 %v565_v20, %v564_v19 }
 0x160   : > { %v543_v47 = vmul.f32 0.01, %v495_v46  ;;  %vm527_vm5 = vcmp.ge.f32.partialorder %v495_v46, 0.0 }
 0x161   : > { %v512_v10 = vpop.f32.mrf.mxu3 }
 0x162   : > { %v559_v23 = vsel %vm527_vm5, %v495_v46, %v543_v47  ;;  %v513_v27 = vadd.f32 %v1999_v41, %v512_v10 }
 0x163   : > { %v572_v50 = vpack.c.bf16 %v559_v23, %v558_v49 }
 0x164   : > { %v550_v34 = vmul.f32 0.01, %v513_v27  ;;  %vm534_vm12 = vcmp.ge.f32.partialorder %v513_v27, 0.0 }
 0x165   : > { %v497_v51 = vpop.f32.mrf.mxu1  ;;  %666 = vmatmul.bf16.gmra.mxu2 %v572_v50 }
 0x166   : > { %v498_v52 = vadd.f32 %v1999_v41, %v497_v51  ;;  %v566_v8 = vsel %vm534_vm12, %v513_v27, %v550_v34 }
 0x168   : > { %v544_v55 = vmul.f32 0.01, %v498_v52  ;;  %vm528_vm6 = vcmp.ge.f32.partialorder %v498_v52, 0.0 }
 0x169   : > { %v514_v21 = vpop.f32.mrf.mxu3 }
 0x16a   : > { %v560_v58 = vsel %vm528_vm6, %v498_v52, %v544_v55  ;;  %v515_v28 = vadd.f32 %v1999_v41, %v514_v21 }
 0x16c   : > { %v551_v35 = vmul.f32 0.01, %v515_v28  ;;  %vm535_vm13 = vcmp.ge.f32.partialorder %v515_v28, 0.0 }
 0x16d   : > { %v499_v54 = vpop.f32.mrf.mxu1 }
 0x16e   : > { %v500_v56 = vadd.f32 %v1999_v41, %v499_v54  ;;  %v567_v36 = vsel %vm535_vm13, %v515_v28, %v551_v35  ;;  %v191_v35 = vpop.permute.xlu1 %190 }
 0x16f   : > { %v576_v37 = vpack.c.bf16 %v567_v36, %v566_v8 }
 0x170   : > { %v545_v57 = vmul.f32 0.01, %v500_v56  ;;  %vm529_vm7 = vcmp.ge.f32.partialorder %v500_v56, 0.0 }
 0x171   : > { %v517_v29 = vpop.f32.mrf.mxu3 }
 0x172   : > { %v561_v59 = vsel %vm529_vm7, %v500_v56, %v545_v57  ;;  %v518_v9 = vadd.f32 %v1999_v41, %v517_v29  ;;  %v1712_v57 = vld [vmem:[%s2363_s1 + $0xf8] sm:$0xff] }
 0x173   : > { %v573_v60 = vpack.c.bf16 %v561_v59, %v560_v58  ;;  %906 = vmatpush.bf16.msrb.mxu3 %v1712_v57 }
 0x174   : > { %v552_v40 = vmul.f32 0.01, %v518_v9  ;;  %vm536_vm14 = vcmp.ge.f32.partialorder %v518_v9, 0.0 }
 0x175   : > { %671 = vmatmul.bf16.gmra.mxu2 %v573_v60 }
 0x176   : > { %v568_v43 = vsel %vm536_vm14, %v518_v9, %v552_v40 }
 0x179   : > { %v519_v38 = vpop.f32.mrf.mxu3 }
 0x17a   : > { %v520_v39 = vadd.f32 %v1999_v41, %v519_v38 }
 0x17c   : > { %v553_v42 = vmul.f32 0.01, %v520_v39  ;;  %vm537_vm15 = vcmp.ge.f32.partialorder %v520_v39, 0.0 }
 0x17e   : > { %v569_v44 = vsel %vm537_vm15, %v520_v39, %v553_v42 }
 0x17f   : > { %v577_v15 = vpack.c.bf16 %v569_v44, %v568_v43  ;;  %v193_v43 = vpop.permute.xlu1 %192 }
 0x185   : > { %676 = vmatmul.bf16.gmra.mxu2 %v574_v5  ;;  %v1706_v5 = vld [vmem:[%s2363_s1 + $0xc8] sm:$0xff] }
 0x195   : > { %681 = vmatmul.bf16.gmra.mxu2 %v575_v22 }
 0x1a5   : > { %686 = vmatmul.bf16.gmra.mxu2 %v576_v37 }
 0x1b5   : > { %691 = vmatmul.bf16.gmra.mxu2 %v577_v15 }
 0x1c8   : > { %v657_v46 = vpop.f32.mrf.mxu2 }
 0x1c9   : > { %v2031_v47 = vadd.f32 %v2028_v45, %v657_v46 }
 0x1cb   : > { %697 = vrot.lane.b32.xlu0 %v2031_v47, %s1800_s22 }
 0x1d0   : > { %v659_v41 = vpop.f32.mrf.mxu2 }
 0x1d1   : > { %v2036_v48 = vadd.f32 %v2028_v45, %v659_v41 }
 0x1d3   : > { %699 = vrot.lane.b32.xlu0 %v2036_v48, %s1800_s22 }
 0x1d8   : > { %v662_v49 = vpop.f32.mrf.mxu2 }
 0x1d9   : > { %v2041_v23 = vadd.f32 %v2028_v45, %v662_v49 }
 0x1db   : > { %701 = vrot.lane.b32.xlu2 %v2041_v23, %s1800_s22  ;;  %194 = vrot.lane.b32.xlu0 %v1880_v14, %s1800_s22 }
 0x1e0   : > { %v664_v50 = vpop.f32.mrf.mxu2 }
 0x1e1   : > { %v2048_v51 = vadd.f32 %v2028_v45, %v664_v50 }
 0x1e3   : > { %703 = vrot.lane.b32.xlu2 %v2048_v51, %s1800_s22 }
 0x1e8   : > { %v667_v52 = vpop.f32.mrf.mxu2 }
 0x1e9   : > { %v2053_v53 = vadd.f32 %v2028_v45, %v667_v52 }
 0x1eb   : > { %705 = vrot.lane.b32.xlu2 %v2053_v53, %s1800_s22 }
 0x1f0   : > { %v669_v54 = vpop.f32.mrf.mxu2 }
 0x1f1   : > { %v2058_v55 = vadd.f32 %v2028_v45, %v669_v54 }
 0x1f3   : > { %707 = vrot.lane.b32.xlu0 %v2058_v55, %s1800_s22  ;;  %200 = vrot.lane.b32.xlu2 %v1908_v24, %s1800_s22  ;;  %v1711_v24 = vld [vmem:[%s2363_s1 + $0xf0] sm:$0xff] }
 0x1f4   : > { %907 = vmatpush.bf16.msrb.mxu3 %v1711_v24 }
 0x1f8   : > { %v672_v14 = vpop.f32.mrf.mxu2 }
 0x1f9   : > { %v2065_v56 = vadd.f32 %v2028_v45, %v672_v14 }
 0x1fb   : > { %709 = vrot.lane.b32.xlu0 %v2065_v56, %s1800_s22  ;;  %202 = vrot.lane.b32.xlu2 %v1924_v30, %s1800_s22  ;;  %v1710_v30 = vld [vmem:[%s2363_s1 + $0xe8] sm:$0xff] }
 0x1fc   : > { %908 = vmatpush.bf16.msrb.mxu3 %v1710_v30 }
 0x200   : > { %v674_v58 = vpop.f32.mrf.mxu2 }
 0x201   : > { %v2075_v59 = vadd.f32 %v2028_v45, %v674_v58  ;;  %v197_v58 = vpop.permute.xlu1 %196 }
 0x203   : > { %711 = vrot.lane.b32.xlu1 %v2075_v59, %s1800_s22  ;;  %204 = vrot.lane.b32.xlu0 %v1927_v31, %s1800_s22  ;;  %v1709_v31 = vld [vmem:[%s2363_s1 + $0xe0] sm:$0xff] }
 0x204   : > { %909 = vmatpush.bf16.msrb.mxu3 %v1709_v31 }
 0x208   : > { %v677_v60 = vpop.f32.mrf.mxu2 }
 0x209   : > { %v2085_v61 = vadd.f32 %v2028_v45, %v677_v60 }
 0x20b   : > { %713 = vrot.lane.b32.xlu1 %v2085_v61, %s1800_s22  ;;  %206 = vrot.lane.b32.xlu0 %v1872_v11, %s1800_s22  ;;  %v1708_v11 = vld [vmem:[%s2363_s1 + $0xd8] sm:$0xff] }
 0x20c   : > { %910 = vmatpush.bf16.msrb.mxu3 %v1708_v11 }
 0x210   : > { %v679_v62 = vpop.f32.mrf.mxu2 }
 0x211   : > { %v2095_v63 = vadd.f32 %v2028_v45, %v679_v62 }
 0x213   : > { %208 = vrot.lane.b32.xlu1 %v1875_v12, %s1800_s22  ;;  %715 = vrot.lane.b32.xlu2 %v2095_v63, %s1800_s22 }
 0x218   : > { %v682_v0 = vpop.f32.mrf.mxu2 }
 0x219   : > { %v2105_v1 = vadd.f32 %v2028_v45, %v682_v0 }
 0x21b   : > { %210 = vrot.lane.b32.xlu1 %v1888_v17, %s1800_s22  ;;  %717 = vrot.lane.b32.xlu2 %v2105_v1, %s1800_s22  ;;  %v1707_v17 = vld [vmem:[%s2363_s1 + $0xd0] sm:$0xff] }
 0x21c   : > { %911 = vmatpush.bf16.msrb.mxu3 %v1707_v17 }
 0x220   : > { %v684_v12 = vpop.f32.mrf.mxu2  ;;  %912 = vmatpush.bf16.msrb.mxu3 %v1706_v5 }
 0x221   : > { %v2115_v2 = vadd.f32 %v2028_v45, %v684_v12 }
 0x223   : > { %719 = vrot.lane.b32.xlu0 %v2115_v2, %s1800_s22  ;;  %212 = vrot.lane.b32.xlu2 %v1891_v18, %s1800_s22 }
 0x224   : > { %913 = vmatpush.bf16.msrb.mxu3 %v1705_v6 }
 0x228   : > { %v687_v3 = vpop.f32.mrf.mxu2 }
 0x229   : > { %v2125_v4 = vadd.f32 %v2028_v45, %v687_v3 }
 0x22b   : > { %721 = vrot.lane.b32.xlu0 %v2125_v4, %s1800_s22  ;;  %214 = vrot.lane.b32.xlu2 %v1911_v25, %s1800_s22  ;;  %v729_v25 = vlaneseq }
 0x22d   : > { %v2144_v13 = vand.u32 127, %v729_v25  ;;  %v199_v25 = vpop.permute.xlu1 %198 }
 0x22f   : > { %vm731_vm0 = vcmp.lt.s32.totalorder %v2144_v13, 10 }
 0x230   : > { %v689_v18 = vpop.f32.mrf.mxu2 }
 0x231   : > { %v2138_v7 = vadd.f32 %v2028_v45, %v689_v18 }
 0x233   : > { %723 = vrot.lane.b32.xlu1 %v2138_v7, %s1800_s22  ;;  %216 = vrot.lane.b32.xlu0 %v1914_v26, %s1800_s22 }
 0x235   : > { %v702_v26 = vpop.permute.xlu2 %701 }
 0x236   : > { %v734_v37 = vsel %vm731_vm0, %v702_v26, 0.0 }
 0x237   : > { %v750_v9 = vmul.f32 0.5, %v734_v37 }
 0x238   : > { %v692_v10 = vpop.f32.mrf.mxu2 }
 0x239   : > { %v2147_v16 = vadd.f32 %v2028_v45, %v692_v10  ;;  %v768_v44 = vmul.f32 1.442695, %v750_v9 }
 0x23b   : > { %725 = vrot.lane.b32.xlu1 %v2147_v16, %s1800_s22  ;;  %218 = vrot.lane.b32.xlu0 %v1930_v32, %s1800_s22 }
 0x23d   : > { %v698_v19 = vpop.permute.xlu0 %697  ;;  %v704_v36 = vpop.permute.xlu2 %703 }
 0x23e   : > { %v732_v20 = vsel %vm731_vm0, %v698_v19, 0.0 }
 0x23f   : > { %v748_v21 = vmul.f32 0.5, %v732_v20 }
 0x240   : > { %v694_v22 = vpop.f32.mrf.mxu2 }
 0x241   : > { %v2157_v27 = vadd.f32 %v2028_v45, %v694_v22  ;;  %v764_v28 = vmul.f32 1.442695, %v748_v21 }
 0x243   : > { %220 = vrot.lane.b32.xlu1 %v1933_v33, %s1800_s22  ;;  %727 = vrot.lane.b32.xlu2 %v2157_v27, %s1800_s22  ;;  %1760 = vpow2.f32 %v764_v28  ;;  %v735_v33 = vsel %vm731_vm0, %v704_v36, 0.0 }
 0x244   : > { %v751_v39 = vmul.f32 0.5, %v735_v33 }
 0x245   : > { %v700_v32 = vpop.permute.xlu0 %699  ;;  %v706_v50 = vpop.permute.xlu2 %705 }
 0x246   : > { %v733_v29 = vsel %vm731_vm0, %v700_v32, 0.0  ;;  %v770_v45 = vmul.f32 1.442695, %v751_v39  ;;  %v736_v52 = vsel %vm731_vm0, %v706_v50, 0.0 }
 0x247   : > { %v749_v34 = vmul.f32 0.5, %v733_v29  ;;  %v752_v24 = vmul.f32 0.5, %v736_v52 }
 0x249   : > { %v766_v8 = vmul.f32 1.442695, %v749_v34  ;;  %v1761_v38 = vpop.eup %1760  ;;  %v772_v62 = vmul.f32 1.442695, %v752_v24 }
 0x24a   : > { %v796_v40 = vmul.f32 %v1761_v38, %v191_v35 }
 0x24b   : > { %1762 = vpow2.f32 %v766_v8 }
 0x24c   : > { %v812_v46 = vadd.f32 %v796_v40, %v2031_v47  ;;  %1764 = vpow2.f32 %v768_v44 }
 0x24d   : > { %1766 = vpow2.f32 %v770_v45  ;;  %v195_v54 = vpop.permute.xlu0 %194  ;;  %v201_v5 = vpop.permute.xlu2 %200 }
 0x24e   : > { %1768 = vpow2.f32 %v772_v62 }
 0x251   : > { %v1763_v42 = vpop.eup %1762 }
 0x252   : > { %v797_v15 = vmul.f32 %v1763_v42, %v193_v43  ;;  %v1765_v14 = vpop.eup %1764 }
 0x253   : > { %v1767_v57 = vpop.eup %1766  ;;  %v798_v60 = vmul.f32 %v1765_v14, %v195_v54 }
 0x254   : > { %v813_v41 = vadd.f32 %v797_v15, %v2036_v48  ;;  %v799_v30 = vmul.f32 %v1767_v57, %v197_v58  ;;  %v1769_v6 = vpop.eup %1768  ;;  %v1720_v58 = vld [vmem:[%s2363_s1 + $0x138] sm:$0xff] }
 0x255   : > { %v814_v31 = vadd.f32 %v798_v60, %v2041_v23  ;;  %v800_v26 = vmul.f32 %v1769_v6, %v199_v25  ;;  %v203_v22 = vpop.permute.xlu2 %202  ;;  %1081 = vmatpush.bf16.msrb.mxu0 %v1720_v58 }
 0x256   : > { %v828_v49 = vpack.c.bf16 %v813_v41, %v812_v46  ;;  %v815_v0 = vadd.f32 %v799_v30, %v2048_v51 }
 0x257   : > { %v816_v29 = vadd.f32 %v800_v26, %v2053_v53 }
 0x258   : > { %914 = vmatmul.bf16.vlgmr.msrb.gmra.mxu3 %v828_v49  ;;  %v829_v3 = vpack.c.bf16 %v815_v0, %v814_v31 }
 0x265   : > { %v708_v11 = vpop.permute.xlu0 %707 }
 0x266   : > { %v737_v12 = vsel %vm731_vm0, %v708_v11, 0.0 }
 0x267   : > { %v753_v17 = vmul.f32 0.5, %v737_v12 }
 0x268   : > { %919 = vmatmul.bf16.gmra.mxu3 %v829_v3  ;;  %v1719_v3 = vld [vmem:[%s2363_s1 + $0x130] sm:$0xff] }
 0x269   : > { %v774_v18 = vmul.f32 1.442695, %v753_v17  ;;  %1082 = vmatpush.bf16.msrb.mxu0 %v1719_v3 }
 0x26b   : > { %1770 = vpow2.f32 %v774_v18 }
 0x26d   : > { %v710_v10 = vpop.permute.xlu0 %709  ;;  %v716_v38 = vpop.permute.xlu2 %715 }
 0x26e   : > { %v738_v19 = vsel %vm731_vm0, %v710_v10, 0.0  ;;  %v741_v42 = vsel %vm731_vm0, %v716_v38, 0.0 }
 0x26f   : > { %v754_v20 = vmul.f32 0.5, %v738_v19  ;;  %v757_v46 = vmul.f32 0.5, %v741_v42 }
 0x271   : > { %v1771_v21 = vpop.eup %1770  ;;  %v776_v32 = vmul.f32 1.442695, %v754_v20  ;;  %v782_v54 = vmul.f32 1.442695, %v757_v46  ;;  %v1715_v46 = vld [vmem:[%s2363_s1 + $0x110] sm:$0xff] }
 0x272   : > { %v801_v28 = vmul.f32 %v1771_v21, %v201_v5  ;;  %v1718_v21 = vld [vmem:[%s2363_s1 + $0x128] sm:$0xff] }
 0x273   : > { %1772 = vpow2.f32 %v776_v32  ;;  %1083 = vmatpush.bf16.msrb.mxu0 %v1718_v21 }
 0x274   : > { %v817_v34 = vadd.f32 %v801_v28, %v2058_v55 }
 0x275   : > { %v712_v35 = vpop.permute.xlu1 %711  ;;  %v205_v44 = vpop.permute.xlu0 %204 }
 0x276   : > { %v739_v8 = vsel %vm731_vm0, %v712_v35, 0.0  ;;  %v830_v36 = vpack.c.bf16 %v817_v34, %v816_v29  ;;  %v718_v57 = vpop.permute.xlu2 %717  ;;  %v1717_v29 = vld [vmem:[%s2363_s1 + $0x120] sm:$0xff] }
 0x277   : > { %v755_v37 = vmul.f32 0.5, %v739_v8  ;;  %v742_v30 = vsel %vm731_vm0, %v718_v57, 0.0  ;;  %1084 = vmatpush.bf16.msrb.mxu0 %v1717_v29 }
 0x278   : > { %924 = vmatmul.bf16.gmra.mxu3 %v830_v36  ;;  %v758_v11 = vmul.f32 0.5, %v742_v30 }
 0x279   : > { %v778_v33 = vmul.f32 1.442695, %v755_v37  ;;  %v1773_v9 = vpop.eup %1772 }
 0x27a   : > { %v802_v15 = vmul.f32 %v1773_v9, %v203_v22  ;;  %v784_v5 = vmul.f32 1.442695, %v758_v11 }
 0x27b   : > { %1774 = vpow2.f32 %v778_v33 }
 0x27c   : > { %v818_v52 = vadd.f32 %v802_v15, %v2065_v56 }
 0x27d   : > { %v714_v39 = vpop.permute.xlu1 %713  ;;  %v207_v60 = vpop.permute.xlu0 %206 }
 0x27e   : > { %v740_v40 = vsel %vm731_vm0, %v714_v39, 0.0  ;;  %v213_v20 = vpop.permute.xlu2 %212 }
 0x27f   : > { %v756_v43 = vmul.f32 0.5, %v740_v40 }
 0x281   : > { %v1775_v45 = vpop.eup %1774  ;;  %v780_v41 = vmul.f32 1.442695, %v756_v43 }
 0x282   : > { %v803_v49 = vmul.f32 %v1775_v45, %v205_v44  ;;  %v1716_v45 = vld [vmem:[%s2363_s1 + $0x118] sm:$0xff] }
 0x283   : > { %1776 = vpow2.f32 %v780_v41  ;;  %1085 = vmatpush.bf16.msrb.mxu0 %v1716_v45 }
 0x284   : > { %v819_v50 = vadd.f32 %v803_v49, %v2075_v59  ;;  %1778 = vpow2.f32 %v782_v54 }
 0x285   : > { %v209_v62 = vpop.permute.xlu1 %208  ;;  %1780 = vpow2.f32 %v784_v5 }
 0x286   : > { %v831_v14 = vpack.c.bf16 %v819_v50, %v818_v52  ;;  %v215_v37 = vpop.permute.xlu2 %214 }
 0x287   : > { %1086 = vmatpush.bf16.msrb.mxu0 %v1715_v46 }
 0x288   : > { %929 = vmatmul.bf16.gmra.mxu3 %v831_v14 }
 0x289   : > { %v1777_v24 = vpop.eup %1776 }
 0x28a   : > { %v804_v31 = vmul.f32 %v1777_v24, %v207_v60  ;;  %v1779_v0 = vpop.eup %1778 }
 0x28b   : > { %v805_v12 = vmul.f32 %v1779_v0, %v209_v62  ;;  %v1781_v34 = vpop.eup %1780 }
 0x28c   : > { %v820_v17 = vadd.f32 %v804_v31, %v2085_v61 }
 0x28d   : > { %v821_v18 = vadd.f32 %v805_v12, %v2095_v63  ;;  %v211_v22 = vpop.permute.xlu1 %210 }
 0x28e   : > { %v806_v8 = vmul.f32 %v1781_v34, %v211_v22  ;;  %v2236_v22 = vld [vmem:[%s2364_s2 + $0x3] ss:$0 sm:$0xff] }
 0x28f   : > { %v832_v19 = vpack.c.bf16 %v821_v18, %v820_v17  ;;  %v1714_v18 = vld [vmem:[%s2363_s1 + $0x108] sm:$0xff] }
 0x290   : > { %v822_v9 = vadd.f32 %v806_v8, %v2105_v1  ;;  %1087 = vmatpush.bf16.msrb.mxu0 %v1714_v18 }
 0x295   : > { %v720_v6 = vpop.permute.xlu0 %719 }
 0x296   : > { %v743_v25 = vsel %vm731_vm0, %v720_v6, 0.0 }
 0x297   : > { %v759_v10 = vmul.f32 0.5, %v743_v25 }
 0x298   : > { %934 = vmatmul.bf16.gmra.mxu3 %v832_v19 }
 0x299   : > { %v786_v26 = vmul.f32 1.442695, %v759_v10 }
 0x29b   : > { %1782 = vpow2.f32 %v786_v26  ;;  %v1713_v26 = vld [vmem:[%s2363_s1 + $0x100] sm:$0xff] }
 0x29c   : > { %1088 = vmatpush.bf16.msrb.mxu0 %v1713_v26 }
 0x29d   : > { %v722_v28 = vpop.permute.xlu0 %721  ;;  %v728_v41 = vpop.permute.xlu2 %727 }
 0x29e   : > { %v744_v32 = vsel %vm731_vm0, %v722_v28, 0.0  ;;  %v747_v54 = vsel %vm731_vm0, %v728_v41, 0.0 }
 0x29f   : > { %v760_v35 = vmul.f32 0.5, %v744_v32  ;;  %v763_v60 = vmul.f32 0.5, %v747_v54 }
 0x2a1   : > { %v1783_v36 = vpop.eup %1782  ;;  %v788_v38 = vmul.f32 1.442695, %v760_v35  ;;  %v794_v11 = vmul.f32 1.442695, %v763_v60 }
 0x2a2   : > { %v807_v33 = vmul.f32 %v1783_v36, %v213_v20 }
 0x2a3   : > { %1784 = vpow2.f32 %v788_v38 }
 0x2a4   : > { %v823_v39 = vadd.f32 %v807_v33, %v2115_v2 }
 0x2a5   : > { %v724_v40 = vpop.permute.xlu1 %723  ;;  %v217_v57 = vpop.permute.xlu0 %216 }
 0x2a6   : > { %v745_v42 = vsel %vm731_vm0, %v724_v40, 0.0  ;;  %v833_v43 = vpack.c.bf16 %v823_v39, %v822_v9 }
 0x2a7   : > { %v761_v44 = vmul.f32 0.5, %v745_v42 }
 0x2a8   : > { %939 = vmatmul.bf16.gmra.mxu3 %v833_v43 }
 0x2a9   : > { %v790_v15 = vmul.f32 1.442695, %v761_v44  ;;  %v1785_v49 = vpop.eup %1784 }
 0x2aa   : > { %v808_v58 = vmul.f32 %v1785_v49, %v215_v37 }
 0x2ab   : > { %1786 = vpow2.f32 %v790_v15 }
 0x2ac   : > { %v824_v0 = vadd.f32 %v808_v58, %v2125_v4 }
 0x2ad   : > { %v726_v50 = vpop.permute.xlu1 %725  ;;  %v219_v13 = vpop.permute.xlu0 %218 }
 0x2ae   : > { %v746_v52 = vsel %vm731_vm0, %v726_v50, 0.0 }
 0x2af   : > { %v762_v14 = vmul.f32 0.5, %v746_v52 }
 0x2b1   : > { %v1787_v24 = vpop.eup %1786  ;;  %v792_v30 = vmul.f32 1.442695, %v762_v14 }
 0x2b2   : > { %v809_v62 = vmul.f32 %v1787_v24, %v217_v57 }
 0x2b3   : > { %1788 = vpow2.f32 %v792_v30 }
 0x2b4   : > { %v825_v31 = vadd.f32 %v809_v62, %v2138_v7  ;;  %1790 = vpow2.f32 %v794_v11 }
 0x2b5   : > { %v221_v3 = vpop.permute.xlu1 %220 }
 0x2b6   : > { %v834_v12 = vpack.c.bf16 %v825_v31, %v824_v0  ;;  %v1728_v0 = vld [vmem:[%s2363_s1 + $0x178] sm:$0xff] }
 0x2b7   : > { %1256 = vmatpush.bf16.msrb.mxu1 %v1728_v0 }
 0x2b8   : > { %944 = vmatmul.bf16.gmra.mxu3 %v834_v12 }
 0x2b9   : > { %v1789_v17 = vpop.eup %1788 }
 0x2ba   : > { %v810_v5 = vmul.f32 %v1789_v17, %v219_v13  ;;  %v1791_v6 = vpop.eup %1790 }
 0x2bb   : > { %v811_v25 = vmul.f32 %v1791_v6, %v221_v3  ;;  %v1727_v3 = vld [vmem:[%s2363_s1 + $0x170] sm:$0xff] }
 0x2bc   : > { %v826_v10 = vadd.f32 %v810_v5, %v2147_v16  ;;  %1257 = vmatpush.bf16.msrb.mxu1 %v1727_v3 }
 0x2bd   : > { %v827_v19 = vadd.f32 %v811_v25, %v2157_v27 }
 0x2bf   : > { %v835_v20 = vpack.c.bf16 %v827_v19, %v826_v10  ;;  %v1726_v19 = vld [vmem:[%s2363_s1 + $0x168] sm:$0xff] }
 0x2c0   : > { %1258 = vmatpush.bf16.msrb.mxu1 %v1726_v19 }
 0x2c8   : > { %949 = vmatmul.bf16.gmra.mxu3 %v835_v20 }
 0x2db   : > { %v915_v21 = vpop.f32.mrf.mxu3 }
 0x2dc   : > { %v916_v28 = vadd.f32 %v2236_v22, %v915_v21 }
 0x2de   : > { %v971_v29 = vmul.f32 0.01, %v916_v28  ;;  %vm955_vm1 = vcmp.ge.f32.partialorder %v916_v28, 0.0 }
 0x2e0   : > { %v987_v8 = vsel %vm955_vm1, %v916_v28, %v971_v29 }
 0x2e3   : > { %v917_v32 = vpop.f32.mrf.mxu3 }
 0x2e4   : > { %v918_v34 = vadd.f32 %v2236_v22, %v917_v32  ;;  %v1725_v32 = vld [vmem:[%s2363_s1 + $0x160] sm:$0xff] }
 0x2e5   : > { %1259 = vmatpush.bf16.msrb.mxu1 %v1725_v32 }
 0x2e6   : > { %vm956_vm2 = vcmp.ge.f32.partialorder %v918_v34, 0.0  ;;  %v972_v35 = vmul.f32 0.01, %v918_v34 }
 0x2e8   : > { %v988_v36 = vsel %vm956_vm2, %v918_v34, %v972_v35 }
 0x2e9   : > { %v1003_v37 = vpack.c.bf16 %v988_v36, %v987_v8 }
 0x2eb   : > { %v920_v33 = vpop.f32.mrf.mxu3  ;;  %1089 = vmatmul.bf16.vlgmr.msrb.gmra.mxu0 %v1003_v37  ;;  %v1724_v37 = vld [vmem:[%s2363_s1 + $0x158] sm:$0xff] }
 0x2ec   : > { %v921_v38 = vadd.f32 %v2236_v22, %v920_v33  ;;  %1260 = vmatpush.bf16.msrb.mxu1 %v1724_v37 }
 0x2ee   : > { %v973_v39 = vmul.f32 0.01, %v921_v38  ;;  %vm957_vm3 = vcmp.ge.f32.partialorder %v921_v38, 0.0 }
 0x2f0   : > { %v989_v43 = vsel %vm957_vm3, %v921_v38, %v973_v39 }
 0x2f3   : > { %v922_v9 = vpop.f32.mrf.mxu3 }
 0x2f4   : > { %v923_v40 = vadd.f32 %v2236_v22, %v922_v9 }
 0x2f6   : > { %v974_v42 = vmul.f32 0.01, %v923_v40  ;;  %vm958_vm4 = vcmp.ge.f32.partialorder %v923_v40, 0.0 }
 0x2f8   : > { %v990_v44 = vsel %vm958_vm4, %v923_v40, %v974_v42  ;;  %v1723_v40 = vld [vmem:[%s2363_s1 + $0x150] sm:$0xff] }
 0x2f9   : > { %v1004_v15 = vpack.c.bf16 %v990_v44, %v989_v43  ;;  %1261 = vmatpush.bf16.msrb.mxu1 %v1723_v40 }
 0x2fb   : > { %v925_v45 = vpop.f32.mrf.mxu3  ;;  %1094 = vmatmul.bf16.gmra.mxu0 %v1004_v15 }
 0x2fc   : > { %v926_v46 = vadd.f32 %v2236_v22, %v925_v45 }
 0x2fe   : > { %v975_v49 = vmul.f32 0.01, %v926_v46  ;;  %vm959_vm5 = vcmp.ge.f32.partialorder %v926_v46, 0.0 }
 0x300   : > { %v991_v54 = vsel %vm959_vm5, %v926_v46, %v975_v49 }
 0x303   : > { %v927_v41 = vpop.f32.mrf.mxu3 }
 0x304   : > { %v928_v50 = vadd.f32 %v2236_v22, %v927_v41 }
 0x306   : > { %v976_v52 = vmul.f32 0.01, %v928_v50  ;;  %vm960_vm6 = vcmp.ge.f32.partialorder %v928_v50, 0.0 }
 0x308   : > { %v992_v14 = vsel %vm960_vm6, %v928_v50, %v976_v52  ;;  %v1722_v52 = vld [vmem:[%s2363_s1 + $0x148] sm:$0xff] }
 0x309   : > { %v1005_v57 = vpack.c.bf16 %v992_v14, %v991_v54  ;;  %1262 = vmatpush.bf16.msrb.mxu1 %v1722_v52 }
 0x30b   : > { %v930_v58 = vpop.f32.mrf.mxu3  ;;  %1099 = vmatmul.bf16.gmra.mxu0 %v1005_v57  ;;  %v1721_v57 = vld [vmem:[%s2363_s1 + $0x140] sm:$0xff] }
 0x30c   : > { %v931_v24 = vadd.f32 %v2236_v22, %v930_v58 }
 0x30d   : > { %1263 = vmatpush.bf16.msrb.mxu1 %v1721_v57 }
 0x30e   : > { %v977_v30 = vmul.f32 0.01, %v931_v24  ;;  %vm961_vm7 = vcmp.ge.f32.partialorder %v931_v24, 0.0 }
 0x310   : > { %v993_v11 = vsel %vm961_vm7, %v931_v24, %v977_v30 }
 0x313   : > { %v932_v60 = vpop.f32.mrf.mxu3 }
 0x314   : > { %v933_v62 = vadd.f32 %v2236_v22, %v932_v60 }
 0x316   : > { %v978_v31 = vmul.f32 0.01, %v933_v62  ;;  %vm962_vm8 = vcmp.ge.f32.partialorder %v933_v62, 0.0 }
 0x318   : > { %v994_v12 = vsel %vm962_vm8, %v933_v62, %v978_v31 }
 0x319   : > { %v1006_v17 = vpack.c.bf16 %v994_v12, %v993_v11  ;;  %v2281_v11 = vld [vmem:[%s2364_s2 + $0x4] ss:$0 sm:$0xff] }
 0x31b   : > { %v935_v13 = vpop.f32.mrf.mxu3  ;;  %1104 = vmatmul.bf16.gmra.mxu0 %v1006_v17 }
 0x31c   : > { %v936_v5 = vadd.f32 %v2236_v22, %v935_v13 }
 0x31e   : > { %v979_v6 = vmul.f32 0.01, %v936_v5  ;;  %vm963_vm9 = vcmp.ge.f32.partialorder %v936_v5, 0.0 }
 0x320   : > { %v995_v20 = vsel %vm963_vm9, %v936_v5, %v979_v6 }
 0x323   : > { %v937_v18 = vpop.f32.mrf.mxu3 }
 0x324   : > { %v938_v25 = vadd.f32 %v2236_v22, %v937_v18 }
 0x326   : > { %v980_v10 = vmul.f32 0.01, %v938_v25  ;;  %vm964_vm10 = vcmp.ge.f32.partialorder %v938_v25, 0.0 }
 0x328   : > { %v996_v26 = vsel %vm964_vm10, %v938_v25, %v980_v10 }
 0x329   : > { %v1007_v21 = vpack.c.bf16 %v996_v26, %v995_v20 }
 0x32b   : > { %v940_v28 = vpop.f32.mrf.mxu3  ;;  %1109 = vmatmul.bf16.gmra.mxu0 %v1007_v21 }
 0x32c   : > { %v941_v29 = vadd.f32 %v2236_v22, %v940_v28 }
 0x32e   : > { %v981_v35 = vmul.f32 0.01, %v941_v29  ;;  %vm965_vm11 = vcmp.ge.f32.partialorder %v941_v29, 0.0 }
 0x330   : > { %v997_v33 = vsel %vm965_vm11, %v941_v29, %v981_v35 }
 0x333   : > { %v942_v34 = vpop.f32.mrf.mxu3 }
 0x334   : > { %v943_v8 = vadd.f32 %v2236_v22, %v942_v34 }
 0x336   : > { %v982_v36 = vmul.f32 0.01, %v943_v8  ;;  %vm966_vm12 = vcmp.ge.f32.partialorder %v943_v8, 0.0 }
 0x338   : > { %v998_v38 = vsel %vm966_vm12, %v943_v8, %v982_v36 }
 0x339   : > { %v1008_v9 = vpack.c.bf16 %v998_v38, %v997_v33 }
 0x33b   : > { %v945_v39 = vpop.f32.mrf.mxu3  ;;  %1114 = vmatmul.bf16.gmra.mxu0 %v1008_v9 }
 0x33c   : > { %v946_v42 = vadd.f32 %v2236_v22, %v945_v39 }
 0x33e   : > { %v983_v44 = vmul.f32 0.01, %v946_v42  ;;  %vm967_vm13 = vcmp.ge.f32.partialorder %v946_v42, 0.0 }
 0x340   : > { %v999_v46 = vsel %vm967_vm13, %v946_v42, %v983_v44 }
 0x343   : > { %v947_v43 = vpop.f32.mrf.mxu3 }
 0x344   : > { %v948_v15 = vadd.f32 %v2236_v22, %v947_v43 }
 0x346   : > { %v984_v45 = vmul.f32 0.01, %v948_v15  ;;  %vm968_vm14 = vcmp.ge.f32.partialorder %v948_v15, 0.0 }
 0x348   : > { %v1000_v41 = vsel %vm968_vm14, %v948_v15, %v984_v45 }
 0x349   : > { %v1009_v49 = vpack.c.bf16 %v1000_v41, %v999_v46 }
 0x34b   : > { %v950_v50 = vpop.f32.mrf.mxu3  ;;  %1119 = vmatmul.bf16.gmra.mxu0 %v1009_v49 }
 0x34c   : > { %v951_v54 = vadd.f32 %v2236_v22, %v950_v50 }
 0x34e   : > { %v985_v58 = vmul.f32 0.01, %v951_v54  ;;  %vm969_vm15 = vcmp.ge.f32.partialorder %v951_v54, 0.0 }
 0x350   : > { %v1001_v30 = vsel %vm969_vm15, %v951_v54, %v985_v58 }
 0x353   : > { %v952_v14 = vpop.f32.mrf.mxu3 }
 0x354   : > { %v953_v24 = vadd.f32 %v2236_v22, %v952_v14 }
 0x356   : > { %v986_v60 = vmul.f32 0.01, %v953_v24  ;;  %vm970_vm0 = vcmp.ge.f32.partialorder %v953_v24, 0.0 }
 0x358   : > { %v1002_v62 = vsel %vm970_vm0, %v953_v24, %v986_v60 }
 0x359   : > { %v1010_v31 = vpack.c.bf16 %v1002_v62, %v1001_v30 }
 0x35b   : > { %1124 = vmatmul.bf16.gmra.mxu0 %v1010_v31 }
 0x368   : > { %v1090_v0 = vpop.f32.mrf.mxu0 }
 0x369   : > { %v1091_v12 = vadd.f32 %v2281_v11, %v1090_v0 }
 0x36b   : > { %v1146_v13 = vmul.f32 0.01, %v1091_v12  ;;  %vm1130_vm1 = vcmp.ge.f32.partialorder %v1091_v12, 0.0 }
 0x36d   : > { %v1162_v5 = vsel %vm1130_vm1, %v1091_v12, %v1146_v13 }
 0x370   : > { %v1092_v17 = vpop.f32.mrf.mxu0 }
 0x371   : > { %v1093_v22 = vadd.f32 %v2281_v11, %v1092_v17 }
 0x373   : > { %vm1131_vm2 = vcmp.ge.f32.partialorder %v1093_v22, 0.0  ;;  %v1147_v3 = vmul.f32 0.01, %v1093_v22 }
 0x375   : > { %v1163_v18 = vsel %vm1131_vm2, %v1093_v22, %v1147_v3 }
 0x376   : > { %v1178_v6 = vpack.c.bf16 %v1163_v18, %v1162_v5 }
 0x378   : > { %v1095_v25 = vpop.f32.mrf.mxu0  ;;  %1264 = vmatmul.bf16.vlgmr.msrb.gmra.mxu1 %v1178_v6 }
 0x379   : > { %v1096_v10 = vadd.f32 %v2281_v11, %v1095_v25 }
 0x37b   : > { %v1148_v20 = vmul.f32 0.01, %v1096_v10  ;;  %vm1132_vm3 = vcmp.ge.f32.partialorder %v1096_v10, 0.0 }
 0x37d   : > { %v1164_v28 = vsel %vm1132_vm3, %v1096_v10, %v1148_v20 }
 0x380   : > { %v1097_v19 = vpop.f32.mrf.mxu0 }
 0x381   : > { %v1098_v26 = vadd.f32 %v2281_v11, %v1097_v19 }
 0x383   : > { %v1149_v21 = vmul.f32 0.01, %v1098_v26  ;;  %vm1133_vm4 = vcmp.ge.f32.partialorder %v1098_v26, 0.0 }
 0x385   : > { %v1165_v32 = vsel %vm1133_vm4, %v1098_v26, %v1149_v21 }
 0x386   : > { %v1179_v29 = vpack.c.bf16 %v1165_v32, %v1164_v28 }
 0x388   : > { %v1100_v34 = vpop.f32.mrf.mxu0  ;;  %1269 = vmatmul.bf16.gmra.mxu1 %v1179_v29 }
 0x389   : > { %v1101_v35 = vadd.f32 %v2281_v11, %v1100_v34 }
 0x38b   : > { %v1150_v36 = vmul.f32 0.01, %v1101_v35  ;;  %vm1134_vm5 = vcmp.ge.f32.partialorder %v1101_v35, 0.0 }
 0x38d   : > { %v1166_v38 = vsel %vm1134_vm5, %v1101_v35, %v1150_v36 }
 0x390   : > { %v1102_v8 = vpop.f32.mrf.mxu0 }
 0x391   : > { %v1103_v37 = vadd.f32 %v2281_v11, %v1102_v8 }
 0x393   : > { %v1151_v33 = vmul.f32 0.01, %v1103_v37  ;;  %vm1135_vm6 = vcmp.ge.f32.partialorder %v1103_v37, 0.0 }
 0x395   : > { %v1167_v9 = vsel %vm1135_vm6, %v1103_v37, %v1151_v33 }
 0x396   : > { %v1180_v39 = vpack.c.bf16 %v1167_v9, %v1166_v38  ;;  %v2302_v9 = vld [vmem:[%s2364_s2 + $0x5] ss:$0 sm:$0xff] }
 0x398   : > { %v1105_v40 = vpop.f32.mrf.mxu0  ;;  %1274 = vmatmul.bf16.gmra.mxu1 %v1180_v39 }
 0x399   : > { %v1106_v42 = vadd.f32 %v2281_v11, %v1105_v40 }
 0x39b   : > { %v1152_v44 = vmul.f32 0.01, %v1106_v42  ;;  %vm1136_vm7 = vcmp.ge.f32.partialorder %v1106_v42, 0.0 }
 0x39d   : > { %v1168_v46 = vsel %vm1136_vm7, %v1106_v42, %v1152_v44 }
 0x3a0   : > { %v1107_v43 = vpop.f32.mrf.mxu0 }
 0x3a1   : > { %v1108_v15 = vadd.f32 %v2281_v11, %v1107_v43 }
 0x3a3   : > { %v1153_v45 = vmul.f32 0.01, %v1108_v15  ;;  %vm1137_vm8 = vcmp.ge.f32.partialorder %v1108_v15, 0.0 }
 0x3a5   : > { %v1169_v41 = vsel %vm1137_vm8, %v1108_v15, %v1153_v45 }
 0x3a6   : > { %v1181_v49 = vpack.c.bf16 %v1169_v41, %v1168_v46 }
 0x3a8   : > { %v1110_v50 = vpop.f32.mrf.mxu0  ;;  %1279 = vmatmul.bf16.gmra.mxu1 %v1181_v49 }
 0x3a9   : > { %v1111_v52 = vadd.f32 %v2281_v11, %v1110_v50 }
 0x3ab   : > { %v1154_v14 = vmul.f32 0.01, %v1111_v52  ;;  %vm1138_vm9 = vcmp.ge.f32.partialorder %v1111_v52, 0.0 }
 0x3ad   : > { %v1170_v24 = vsel %vm1138_vm9, %v1111_v52, %v1154_v14 }
 0x3b0   : > { %v1112_v54 = vpop.f32.mrf.mxu0 }
 0x3b1   : > { %v1113_v57 = vadd.f32 %v2281_v11, %v1112_v54 }
 0x3b3   : > { %v1155_v58 = vmul.f32 0.01, %v1113_v57  ;;  %vm1139_vm10 = vcmp.ge.f32.partialorder %v1113_v57, 0.0 }
 0x3b5   : > { %v1171_v60 = vsel %vm1139_vm10, %v1113_v57, %v1155_v58 }
 0x3b6   : > { %v1182_v30 = vpack.c.bf16 %v1171_v60, %v1170_v24 }
 0x3b8   : > { %v1115_v62 = vpop.f32.mrf.mxu0  ;;  %1284 = vmatmul.bf16.gmra.mxu1 %v1182_v30 }
 0x3b9   : > { %v1116_v31 = vadd.f32 %v2281_v11, %v1115_v62 }
 0x3bb   : > { %v1156_v12 = vmul.f32 0.01, %v1116_v31  ;;  %vm1140_vm11 = vcmp.ge.f32.partialorder %v1116_v31, 0.0 }
 0x3bd   : > { %v1172_v22 = vsel %vm1140_vm11, %v1116_v31, %v1156_v12 }
 0x3c0   : > { %v1117_v0 = vpop.f32.mrf.mxu0 }
 0x3c1   : > { %v1118_v17 = vadd.f32 %v2281_v11, %v1117_v0 }
 0x3c3   : > { %v1157_v13 = vmul.f32 0.01, %v1118_v17  ;;  %vm1141_vm12 = vcmp.ge.f32.partialorder %v1118_v17, 0.0 }
 0x3c5   : > { %v1173_v3 = vsel %vm1141_vm12, %v1118_v17, %v1157_v13 }
 0x3c6   : > { %v1183_v5 = vpack.c.bf16 %v1173_v3, %v1172_v22 }
 0x3c8   : > { %v1120_v18 = vpop.f32.mrf.mxu0  ;;  %1289 = vmatmul.bf16.gmra.mxu1 %v1183_v5 }
 0x3c9   : > { %v1121_v6 = vadd.f32 %v2281_v11, %v1120_v18 }
 0x3cb   : > { %v1158_v10 = vmul.f32 0.01, %v1121_v6  ;;  %vm1142_vm13 = vcmp.ge.f32.partialorder %v1121_v6, 0.0 }
 0x3cd   : > { %v1174_v26 = vsel %vm1142_vm13, %v1121_v6, %v1158_v10 }
 0x3d0   : > { %v1122_v25 = vpop.f32.mrf.mxu0 }
 0x3d1   : > { %v1123_v19 = vadd.f32 %v2281_v11, %v1122_v25 }
 0x3d3   : > { %v1159_v20 = vmul.f32 0.01, %v1123_v19  ;;  %vm1143_vm14 = vcmp.ge.f32.partialorder %v1123_v19, 0.0 }
 0x3d5   : > { %v1175_v21 = vsel %vm1143_vm14, %v1123_v19, %v1159_v20 }
 0x3d6   : > { %v1184_v28 = vpack.c.bf16 %v1175_v21, %v1174_v26 }
 0x3d8   : > { %v1125_v32 = vpop.f32.mrf.mxu0  ;;  %1294 = vmatmul.bf16.gmra.mxu1 %v1184_v28 }
 0x3d9   : > { %v1126_v29 = vadd.f32 %v2281_v11, %v1125_v32 }
 0x3db   : > { %v1160_v35 = vmul.f32 0.01, %v1126_v29  ;;  %vm1144_vm15 = vcmp.ge.f32.partialorder %v1126_v29, 0.0 }
 0x3dd   : > { %v1176_v37 = vsel %vm1144_vm15, %v1126_v29, %v1160_v35 }
 0x3e0   : > { %v1127_v34 = vpop.f32.mrf.mxu0 }
 0x3e1   : > { %v1128_v8 = vadd.f32 %v2281_v11, %v1127_v34 }
 0x3e3   : > { %v1161_v36 = vmul.f32 0.01, %v1128_v8  ;;  %vm1145_vm0 = vcmp.ge.f32.partialorder %v1128_v8, 0.0 }
 0x3e5   : > { %v1177_v33 = vsel %vm1145_vm0, %v1128_v8, %v1161_v36 }
 0x3e6   : > { %v1185_v38 = vpack.c.bf16 %v1177_v33, %v1176_v37 }
 0x3e8   : > { %1299 = vmatmul.bf16.gmra.mxu1 %v1185_v38 }
 0x3f5   : > { %v1265_v39 = vpop.f32.mrf.mxu1 }
 0x3f6   : > { %v1266_v40 = vadd.f32 %v2302_v9, %v1265_v39 }
 0x3f8   : > { %v1305_v11 = vadd.f32 %v1266_v40, %v2031_v47 }
 0x3fa   : > { %1321 = vst [vmem:[%s2310_s7] sm:$0xff] %v1305_v11 }
 0x3fd   : > { %v1267_v42 = vpop.f32.mrf.mxu1 }
 0x3fe   : > { %v1268_v43 = vadd.f32 %v2302_v9, %v1267_v42 }
 0x400   : > { %v1306_v44 = vadd.f32 %v1268_v43, %v2036_v48 }
 0x402   : > { %1322 = vst [vmem:[%s2310_s7 + $0x8] sm:$0xff] %v1306_v44 }
 0x405   : > { %v1270_v15 = vpop.f32.mrf.mxu1 }
 0x406   : > { %v1271_v45 = vadd.f32 %v2302_v9, %v1270_v15 }
 0x408   : > { %v1307_v46 = vadd.f32 %v1271_v45, %v2041_v23 }
 0x40a   : > { %1323 = vst [vmem:[%s2310_s7 + $0x10] sm:$0xff] %v1307_v46 }
 0x40d   : > { %v1272_v41 = vpop.f32.mrf.mxu1 }
 0x40e   : > { %v1273_v49 = vadd.f32 %v2302_v9, %v1272_v41 }
 0x410   : > { %v1308_v47 = vadd.f32 %v1273_v49, %v2048_v51 }
 0x412   : > { %1324 = vst [vmem:[%s2310_s7 + $0x18] sm:$0xff] %v1308_v47 }
 0x415   : > { %v1275_v50 = vpop.f32.mrf.mxu1 }
 0x416   : > { %v1276_v52 = vadd.f32 %v2302_v9, %v1275_v50 }
 0x418   : > { %v1309_v48 = vadd.f32 %v1276_v52, %v2053_v53 }
 0x41a   : > { %1325 = vst [vmem:[%s2310_s7 + $0x20] sm:$0xff] %v1309_v48 }
 0x41d   : > { %v1277_v54 = vpop.f32.mrf.mxu1 }
 0x41e   : > { %v1278_v14 = vadd.f32 %v2302_v9, %v1277_v54 }
 0x420   : > { %v1310_v23 = vadd.f32 %v1278_v14, %v2058_v55 }
 0x422   : > { %1326 = vst [vmem:[%s2310_s7 + $0x28] sm:$0xff] %v1310_v23 }
 0x425   : > { %v1280_v57 = vpop.f32.mrf.mxu1 }
 0x426   : > { %v1281_v58 = vadd.f32 %v2302_v9, %v1280_v57 }
 0x428   : > { %v1311_v51 = vadd.f32 %v1281_v58, %v2065_v56 }
 0x42a   : > { %1327 = vst [vmem:[%s2310_s7 + $0x30] sm:$0xff] %v1311_v51 }
 0x42d   : > { %v1282_v24 = vpop.f32.mrf.mxu1 }
 0x42e   : > { %v1283_v60 = vadd.f32 %v2302_v9, %v1282_v24 }
 0x430   : > { %v1312_v53 = vadd.f32 %v1283_v60, %v2075_v59 }
 0x432   : > { %1328 = vst [vmem:[%s2310_s7 + $0x38] sm:$0xff] %v1312_v53 }
 0x435   : > { %v1285_v30 = vpop.f32.mrf.mxu1 }
 0x436   : > { %v1286_v62 = vadd.f32 %v2302_v9, %v1285_v30 }
 0x438   : > { %v1313_v55 = vadd.f32 %v1286_v62, %v2085_v61 }
 0x43a   : > { %1329 = vst [vmem:[%s2310_s7 + $0x40] sm:$0xff] %v1313_v55 }
 0x43d   : > { %v1287_v31 = vpop.f32.mrf.mxu1 }
 0x43e   : > { %v1288_v0 = vadd.f32 %v2302_v9, %v1287_v31 }
 0x440   : > { %v1314_v56 = vadd.f32 %v1288_v0, %v2095_v63 }
 0x442   : > { %1330 = vst [vmem:[%s2310_s7 + $0x48] sm:$0xff] %v1314_v56 }
 0x445   : > { %v1290_v12 = vpop.f32.mrf.mxu1 }
 0x446   : > { %v1291_v17 = vadd.f32 %v2302_v9, %v1290_v12 }
 0x448   : > { %v1315_v59 = vadd.f32 %v1291_v17, %v2105_v1 }
 0x44a   : > { %1331 = vst [vmem:[%s2310_s7 + $0x50] sm:$0xff] %v1315_v59 }
 0x44d   : > { %v1292_v13 = vpop.f32.mrf.mxu1 }
 0x44e   : > { %v1293_v22 = vadd.f32 %v2302_v9, %v1292_v13 }
 0x450   : > { %v1316_v61 = vadd.f32 %v1293_v22, %v2115_v2 }
 0x452   : > { %1332 = vst [vmem:[%s2310_s7 + $0x58] sm:$0xff] %v1316_v61 }
 0x455   : > { %v1295_v3 = vpop.f32.mrf.mxu1 }
 0x456   : > { %v1296_v5 = vadd.f32 %v2302_v9, %v1295_v3 }
 0x458   : > { %v1317_v63 = vadd.f32 %v1296_v5, %v2125_v4 }
 0x45a   : > { %1333 = vst [vmem:[%s2310_s7 + $0x60] sm:$0xff] %v1317_v63 }
 0x45d   : > { %v1297_v18 = vpop.f32.mrf.mxu1 }
 0x45e   : > { %v1298_v6 = vadd.f32 %v2302_v9, %v1297_v18 }
 0x460   : > { %v1318_v1 = vadd.f32 %v1298_v6, %v2138_v7 }
 0x462   : > { %1334 = vst [vmem:[%s2310_s7 + $0x68] sm:$0xff] %v1318_v1 }
 0x465   : > { %v1300_v25 = vpop.f32.mrf.mxu1 }
 0x466   : > { %v1301_v10 = vadd.f32 %v2302_v9, %v1300_v25 }
 0x468   : > { %v1319_v19 = vadd.f32 %v1301_v10, %v2147_v16 }
 0x46a   : > { %1335 = vst [vmem:[%s2310_s7 + $0x70] sm:$0xff] %v1319_v19 }
 0x46d   : > { %v1302_v2 = vpop.f32.mrf.mxu1 }
 0x46e   : > { %v1303_v20 = vadd.f32 %v2302_v9, %v1302_v2 }
 0x470   : > { %v1320_v26 = vadd.f32 %v1303_v20, %v2157_v27 }
 0x472   : > { %1336 = vst [vmem:[%s2310_s7 + $0x78] sm:$0xff] %v1320_v26 }
 0x473 PF: > { %s13_s12 = sadd.s32 1, %s1798_s12  }
 0x474   : > { %p10_p4 = scmp.ge.s32.totalorder %s13_s12, 4  }
 0x476   :  { %12 = sbr.rel (!%p10_p4) target bundleno = 1 (0x1), region = 72 }

</bundles_post_ra>
